<compile_context>
chip_gen: v5e
topology: v5e:2x2
jax: 0.10.0
libtpu: 0.0.40
codegen_flags: <defaults>
</compile_context>

<pallas_src>
import functools

import jax
import jax.numpy as jnp
from jax.experimental import pallas as pl
from jax.experimental.pallas import tpu as pltpu


def _vmem():
    return pl.BlockSpec(memory_space=pltpu.MemorySpace.VMEM)


def _rup8(n):
    return ((n + 7) // 8) * 8


# ------------------------------------------------------------ fused layer ----
def _fused_layer_kernel(*refs, T, E, H, n_lstm, apply_fc):
    """One GNN layer: LSTM edge encoder + message + reduce + NodeUpdate (+fc).

    Ref order (all VMEM, whole-array blocks):
      h        [N, D]    previous layer activations (rows padded)
      x        [T*E, F]  time-major LSTM inputs, flattened (t-major rows)
      lens     [E, 1]    int32 valid sequence lengths (0 for padded edges)
      per LSTM layer l:  wih [F_l, 4H], whh [H, 4H], b [1, 4H]  (gate order i,f,g,o)
      sel_src  [E, N]    one-hot gather of source nodes
      sel_nid  [Nd, N]   one-hot gather of layer_nid (self nodes)
      adj      [Nd, E]   one-hot dst incidence (segment sum)
      norm     [Nd, 1]
      weo1f    [D, H]    (I - w w^T) @ W_eo1   (rank-1 removal folded in)
      weo1     [D, H]    original W_eo1        (self_h_tmp path)
      weo2     [H, H],  beo [1, H]
      wnu1     [D, H],  wnu2 [H, H],  bnu [1, H]
      (fc_w [H, C], fc_b [1, C])  only on the last layer
      out      [Nd, H] or [Nd, C]
    """
    it = iter(refs)
    h_ref = next(it)
    x_ref = next(it)
    lens_ref = next(it)
    lstm_w = [(next(it), next(it), next(it)) for _ in range(n_lstm)]
    sel_src_ref = next(it)
    sel_nid_ref = next(it)
    adj_ref = next(it)
    norm_ref = next(it)
    weo1f_ref = next(it)
    weo1_ref = next(it)
    weo2_ref = next(it)
    beo_ref = next(it)
    wnu1_ref = next(it)
    wnu2_ref = next(it)
    bnu_ref = next(it)
    if apply_fc:
        fcw_ref = next(it)
        fcb_ref = next(it)
    out_ref = next(it)

    lens = lens_ref[...]                                   # [E, 1] int32

    # ---- stacked LSTM over edge sequences; T fully unrolled -----------------
    seq_in = x_ref[...]                                    # [T*E, F0]
    hlast = jnp.zeros((E, H), jnp.float32)
    for l in range(n_lstm):
        wih_ref, whh_ref, b_ref = lstm_w[l]
        whh = whh_ref[...]
        # hoisted input projection: one [T*E, F] x [F, 4H] matmul, bias folded in
        xg = (jnp.dot(seq_in, wih_ref[...], preferred_element_type=jnp.float32)
              + b_ref[...])                                # [T*E, 4H]
        h = jnp.zeros((E, H), jnp.float32)
        c = jnp.zeros((E, H), jnp.float32)
        hlast = jnp.zeros((E, H), jnp.float32)
        step_hs = []
        for t in range(T):                                 # unrolled recurrence
            g = xg[t * E:(t + 1) * E, :] + jnp.dot(
                h, whh, preferred_element_type=jnp.float32)
            i_g = jax.nn.sigmoid(g[:, 0 * H:1 * H])
            f_g = jax.nn.sigmoid(g[:, 1 * H:2 * H])
            g_g = jnp.tanh(g[:, 2 * H:3 * H])
            o_g = jax.nn.sigmoid(g[:, 3 * H:4 * H])
            c = f_g * c + i_g * g_g
            h = o_g * jnp.tanh(c)
            hlast = jnp.where(lens > t, h, hlast)          # capture h at step len-1
            if l + 1 < n_lstm:
                step_hs.append(h)
        if l + 1 < n_lstm:
            # sequence for the next stacked layer stays in registers/VMEM values
            seq_in = jnp.concatenate(step_hs, axis=0)      # [T*E, H]
    e_lstm = hlast                                         # [E, H]

    # ---- per-edge message + dense segment-sum reduce -------------------------
    h_nodes = h_ref[...]
    hW1 = jnp.dot(h_nodes, weo1f_ref[...],
                  preferred_element_type=jnp.float32)                     # [N, H]
    h_srcW1 = jnp.dot(sel_src_ref[...], hW1,
                      preferred_element_type=jnp.float32)                 # [E, H]
    m = jnp.maximum(
        h_srcW1
        + jnp.dot(e_lstm, weo2_ref[...], preferred_element_type=jnp.float32)
        + beo_ref[...], 0.0)                                              # [E, H]
    agg = jnp.dot(adj_ref[...], m, preferred_element_type=jnp.float32)    # [Nd, H]

    # ---- NodeUpdate(test=True) -----------------------------------------------
    self_h = jnp.dot(sel_nid_ref[...], h_nodes,
                     preferred_element_type=jnp.float32)                  # [Nd, D]
    self_h_tmp = (jnp.dot(self_h, weo1_ref[...],
                          preferred_element_type=jnp.float32) + beo_ref[...])
    hh = (agg - self_h_tmp) * norm_ref[...]
    act = jnp.maximum(
        jnp.dot(self_h, wnu1_ref[...], preferred_element_type=jnp.float32)
        + jnp.dot(hh, wnu2_ref[...], preferred_element_type=jnp.float32)
        + bnu_ref[...], 0.0)                                              # [Nd, H]

    if apply_fc:
        act = (jnp.dot(act, fcw_ref[...], preferred_element_type=jnp.float32)
               + fcb_ref[...])
    out_ref[...] = act


def fused_layer(h_pad, x_flat, lens, lstm_weights, sel_src, sel_nid, adj, norm,
                w_eo1_folded, w_eo1, w_eo2, b_eo, w_nu1, w_nu2, b_nu,
                fc_w=None, fc_b=None, *, T, H):
    E = sel_src.shape[0]
    Nd = adj.shape[0]
    apply_fc = fc_w is not None
    out_dim = fc_w.shape[1] if apply_fc else H

    args = [h_pad, x_flat, lens]
    for (wih, whh, b) in lstm_weights:
        args += [wih, whh, b]
    args += [sel_src, sel_nid, adj, norm,
             w_eo1_folded, w_eo1, w_eo2, b_eo, w_nu1, w_nu2, b_nu]
    if apply_fc:
        args += [fc_w, fc_b]

    kernel = functools.partial(
        _fused_layer_kernel, T=T, E=E, H=H,
        n_lstm=len(lstm_weights), apply_fc=apply_fc)

    return pl.pallas_call(
        kernel,
        out_shape=jax.ShapeDtypeStruct((Nd, out_dim), jnp.float32),
        in_specs=[_vmem() for _ in args],
        out_specs=_vmem(),
    )(*args)


# ----------------------------------------------------------------- forward --
def pedge_lstm_infer_forward(params, graph, node_features, *,
                             num_layers, num_lstm_layers, layer_sizes):
    del num_lstm_layers  # implied by params["layers"][i]["lstm"]

    N0 = layer_sizes[0]
    act = jnp.pad(node_features, ((0, _rup8(N0) - N0), (0, 0)))   # padded [N0p, D]

    for i in range(num_layers):
        blk = graph["blocks"][i]
        p = params["layers"][i]

        n_src, n_dst = layer_sizes[i], layer_sizes[i + 1]
        Np, Ndp = _rup8(n_src), _rup8(n_dst)
        E = int(blk["src"].shape[0])
        Ep = _rup8(E)
        T = int(blk["e"].shape[1])

        # edge sequence = cat(edge_features, seq_times[..., None]); time-major,
        # padded on the edge axis, flattened to [T*Ep, F] (glue, plain JAX)
        x = jnp.concatenate([blk["e"], blk["e_times"][..., None]], axis=-1)
        x = jnp.transpose(x, (1, 0, 2))                            # [T, E, F]
        x = jnp.pad(x, ((0, 0), (0, Ep - E), (0, 0)))
        x_flat = x.reshape(T * Ep, x.shape[-1])
        lens = jnp.pad(blk["e_len"].astype(jnp.int32), (0, Ep - E)).reshape(Ep, 1)

        # one-hot selectors (padded indices = -1 -> all-zero rows/cols, inert)
        src = jnp.pad(blk["src"].astype(jnp.int32), (0, Ep - E), constant_values=-1)
        dst = jnp.pad(blk["dst"].astype(jnp.int32), (0, Ep - E), constant_values=-1)
        nid = jnp.pad(blk["layer_nid"].astype(jnp.int32), (0, Ndp - n_dst),
                      constant_values=-1)
        sel_src = (src[:, None] == jnp.arange(Np)[None, :]).astype(jnp.float32)
        sel_nid = (nid[:, None] == jnp.arange(Np)[None, :]).astype(jnp.float32)
        adj = (dst[None, :] == jnp.arange(Ndp)[:, None]).astype(jnp.float32)
        norm = jnp.pad(blk["norm"], ((0, Ndp - n_dst), (0, 0)))

        # fold rank-1 projection removal into the message weight (trace-time):
        # h2 @ W_eo1 == h @ ((I - w^T w) @ W_eo1)   with proj_w stored as row [1, D]
        w = p["proj_w"]
        w_eo1_f = p["W_eo1"] - w.T @ (w @ p["W_eo1"])

        is_last = (i == num_layers - 1)
        act = fused_layer(
            act, x_flat, lens, p["lstm"], sel_src, sel_nid, adj, norm,
            w_eo1_f, p["W_eo1"], p["W_eo2"], p["b_eo"],
            p["W_nu1"], p["W_nu2"], p["b_nu"],
            params["fc_w"] if is_last else None,
            params["fc_b"] if is_last else None,
            T=T, H=p["W_eo2"].shape[0])

    return act[:layer_sizes[-1]]                                   # drop padded rows


# -------------------------------------------------------------------- main --
def _init(key, shape, scale=0.1):
    return scale * jax.random.normal(key, shape, dtype=jnp.float32)


if __name__ == "__main__":
    key = jax.random.PRNGKey(0)

    # model config (small, consistent with the module's __init__)
    node_in_dim = 16
    H = 32                       # node_hidden_dim
    edge_feat_dim = 7
    edge_in_dim = edge_feat_dim + 1
    num_class = 4
    num_layers = 2
    num_lstm_layers = 1
    T = 6                        # edge sequence length

    # synthetic NodeFlow: layer sizes and block edge counts
    layer_sizes = [12, 8, 4]
    edge_counts = [20, 10]

    # ------------------------- parameters (deterministic) -------------------
    params = {"layers": []}
    k = 0

    def nk():
        global k
        k += 1
        return jax.random.fold_in(key, k)

    for i in range(num_layers):
        D = node_in_dim if i == 0 else H
        lstm_ws = []
        for l in range(num_lstm_layers):
            F_in = edge_in_dim if l == 0 else H
            lstm_ws.append((_init(nk(), (F_in, 4 * H)),
                            _init(nk(), (H, 4 * H)),
                            _init(nk(), (1, 4 * H))))
        params["layers"].append({
            "lstm": lstm_ws,
            "proj_w": _init(nk(), (1, D), scale=0.01),   # node_project_w (xavier gain=0.01)
            "W_eo1": _init(nk(), (D, H)),                # edge_out_layer, rows for h part
            "W_eo2": _init(nk(), (H, H)),                # edge_out_layer, rows for e part
            "b_eo": _init(nk(), (1, H)),
            "W_nu1": _init(nk(), (D, H)),                # NodeUpdate linear, rows for self_h
            "W_nu2": _init(nk(), (H, H)),                # NodeUpdate linear, rows for h
            "b_nu": _init(nk(), (1, H)),
        })
    params["fc_w"] = _init(nk(), (H, num_class))
    params["fc_b"] = _init(nk(), (1, num_class))

    # ------------------------- synthetic graph data --------------------------
    graph = {"blocks": []}
    for i in range(num_layers):
        E = edge_counts[i]
        n_src, n_dst = layer_sizes[i], layer_sizes[i + 1]
        src = jax.random.randint(nk(), (E,), 0, n_src)
        # make sure every dst node has at least one in-edge
        dst = jnp.concatenate([jnp.arange(n_dst, dtype=jnp.int32),
                               jax.random.randint(nk(), (E - n_dst,), 0, n_dst)])
        layer_nid = jax.random.randint(nk(), (n_dst,), 0, n_src)
        in_deg = jnp.sum((dst[None, :] == jnp.arange(n_dst)[:, None]).astype(jnp.float32),
                         axis=1, keepdims=True)
        norm = 1.0 / jnp.maximum(in_deg, 1.0)
        graph["blocks"].append({
            "src": src,
            "dst": dst,
            "layer_nid": layer_nid,
            "norm": norm,
            "e": _init(nk(), (E, T, edge_feat_dim), scale=1.0),
            "e_times": _init(nk(), (E, T), scale=1.0),
            "e_len": jax.random.randint(nk(), (E,), 1, T + 1),
        })

    node_features = _init(nk(), (layer_sizes[0], node_in_dim), scale=1.0)

    out = pedge_lstm_infer_forward(
        params, graph, node_features,
        num_layers=num_layers, num_lstm_layers=num_lstm_layers,
        layer_sizes=layer_sizes)
    out = jax.block_until_ready(out)
    assert out.shape == (layer_sizes[-1], num_class)
    assert bool(jnp.all(jnp.isfinite(out)))
    print("KERNEL_OK")
</pallas_src>

<mosaic_0001>
module attributes {stable_mosaic.version = 11 : i64} {
  func.func @_fused_layer_kernel(%arg0: memref<16x16xf32, #tpu.memory_space<vmem>>, %arg1: memref<144x8xf32, #tpu.memory_space<vmem>>, %arg2: memref<24x1xi32, #tpu.memory_space<vmem>>, %arg3: memref<8x128xf32, #tpu.memory_space<vmem>>, %arg4: memref<32x128xf32, #tpu.memory_space<vmem>>, %arg5: memref<1x128xf32, #tpu.memory_space<vmem>>, %arg6: memref<24x16xf32, #tpu.memory_space<vmem>>, %arg7: memref<8x16xf32, #tpu.memory_space<vmem>>, %arg8: memref<8x24xf32, #tpu.memory_space<vmem>>, %arg9: memref<8x1xf32, #tpu.memory_space<vmem>>, %arg10: memref<16x32xf32, #tpu.memory_space<vmem>>, %arg11: memref<16x32xf32, #tpu.memory_space<vmem>>, %arg12: memref<32x32xf32, #tpu.memory_space<vmem>>, %arg13: memref<1x32xf32, #tpu.memory_space<vmem>>, %arg14: memref<16x32xf32, #tpu.memory_space<vmem>>, %arg15: memref<32x32xf32, #tpu.memory_space<vmem>>, %arg16: memref<1x32xf32, #tpu.memory_space<vmem>>, %arg17: memref<8x32xf32, #tpu.memory_space<vmem>>) attributes {dimension_semantics = [], scalar_prefetch = 0 : i64, scratch_operands = 0 : i64, tpu.core_type = #tpu.core_type<tc>} {
    %c0 = arith.constant 0 : index
    %c0_0 = arith.constant 0 : index
    %0 = vector.load %arg2[%c0, %c0_0] : memref<24x1xi32, #tpu.memory_space<vmem>>, vector<24x1xi32>
    %c0_1 = arith.constant 0 : index
    %c0_2 = arith.constant 0 : index
    %1 = vector.load %arg1[%c0_1, %c0_2] : memref<144x8xf32, #tpu.memory_space<vmem>>, vector<144x8xf32>
    %c0_3 = arith.constant 0 : index
    %c0_4 = arith.constant 0 : index
    %2 = vector.load %arg4[%c0_3, %c0_4] : memref<32x128xf32, #tpu.memory_space<vmem>>, vector<32x128xf32>
    %c0_5 = arith.constant 0 : index
    %c0_6 = arith.constant 0 : index
    %3 = vector.load %arg3[%c0_5, %c0_6] : memref<8x128xf32, #tpu.memory_space<vmem>>, vector<8x128xf32>
    %cst = arith.constant dense<0.000000e+00> : vector<144x128xf32>
    %4 = tpu.matmul %1, %3, %cst {dimension_numbers = #tpu.dot_dimension_numbers<[1], [0], [0], [1], [0, 0, 1, 1], [], []>} : vector<144x8xf32>, vector<8x128xf32>, vector<144x128xf32> -> vector<144x128xf32>
    %c0_7 = arith.constant 0 : index
    %c0_8 = arith.constant 0 : index
    %5 = vector.load %arg5[%c0_7, %c0_8] : memref<1x128xf32, #tpu.memory_space<vmem>>, vector<1x128xf32>
    %6 = vector.broadcast %5 : vector<1x128xf32> to vector<144x128xf32>
    %7 = arith.addf %4, %6 : vector<144x128xf32>
    %cst_9 = arith.constant 0.000000e+00 : f32
    %8 = vector.broadcast %cst_9 : f32 to vector<24x32xf32>
    %cst_10 = arith.constant 0.000000e+00 : f32
    %9 = vector.broadcast %cst_10 : f32 to vector<24x32xf32>
    %cst_11 = arith.constant 0.000000e+00 : f32
    %10 = vector.broadcast %cst_11 : f32 to vector<24x32xf32>
    %11 = vector.extract_strided_slice %7 {offsets = [0, 0], sizes = [24, 128], strides = [1, 1]} : vector<144x128xf32> to vector<24x128xf32>
    %cst_12 = arith.constant dense<0.000000e+00> : vector<24x128xf32>
    %12 = tpu.matmul %8, %2, %cst_12 {dimension_numbers = #tpu.dot_dimension_numbers<[1], [0], [0], [1], [0, 0, 1, 1], [], []>} : vector<24x32xf32>, vector<32x128xf32>, vector<24x128xf32> -> vector<24x128xf32>
    %13 = arith.addf %11, %12 : vector<24x128xf32>
    %14 = vector.extract_strided_slice %13 {offsets = [0, 0], sizes = [24, 32], strides = [1, 1]} : vector<24x128xf32> to vector<24x32xf32>
    %15 = arith.negf %14 : vector<24x32xf32>
    %16 = math.exp %15 : vector<24x32xf32>
    %cst_13 = arith.constant 1.000000e+00 : f32
    %17 = vector.broadcast %cst_13 : f32 to vector<24x32xf32>
    %18 = arith.addf %17, %16 : vector<24x32xf32>
    %19 = arith.divf %17, %18 : vector<24x32xf32>
    %20 = vector.extract_strided_slice %13 {offsets = [0, 32], sizes = [24, 32], strides = [1, 1]} : vector<24x128xf32> to vector<24x32xf32>
    %21 = arith.negf %20 : vector<24x32xf32>
    %22 = math.exp %21 : vector<24x32xf32>
    %cst_14 = arith.constant 1.000000e+00 : f32
    %23 = vector.broadcast %cst_14 : f32 to vector<24x32xf32>
    %24 = arith.addf %23, %22 : vector<24x32xf32>
    %25 = arith.divf %23, %24 : vector<24x32xf32>
    %26 = vector.extract_strided_slice %13 {offsets = [0, 64], sizes = [24, 32], strides = [1, 1]} : vector<24x128xf32> to vector<24x32xf32>
    %27 = math.tanh %26 : vector<24x32xf32>
    %28 = vector.extract_strided_slice %13 {offsets = [0, 96], sizes = [24, 32], strides = [1, 1]} : vector<24x128xf32> to vector<24x32xf32>
    %29 = arith.negf %28 : vector<24x32xf32>
    %30 = math.exp %29 : vector<24x32xf32>
    %cst_15 = arith.constant 1.000000e+00 : f32
    %31 = vector.broadcast %cst_15 : f32 to vector<24x32xf32>
    %32 = arith.addf %31, %30 : vector<24x32xf32>
    %33 = arith.divf %31, %32 : vector<24x32xf32>
    %34 = arith.mulf %25, %9 : vector<24x32xf32>
    %35 = arith.mulf %19, %27 : vector<24x32xf32>
    %36 = arith.addf %34, %35 : vector<24x32xf32>
    %37 = math.tanh %36 : vector<24x32xf32>
    %38 = arith.mulf %33, %37 : vector<24x32xf32>
    %c0_i32 = arith.constant 0 : i32
    %39 = vector.broadcast %c0_i32 : i32 to vector<24x1xi32>
    %40 = arith.cmpi sgt, %0, %39 : vector<24x1xi32>
    %41 = vector.shape_cast %40 : vector<24x1xi1> to vector<24x1xi1>
    %42 = vector.broadcast %41 : vector<24x1xi1> to vector<24x32xi1>
    %43 = arith.select %42, %38, %10 : vector<24x32xi1>, vector<24x32xf32>
    %44 = vector.extract_strided_slice %7 {offsets = [24, 0], sizes = [24, 128], strides = [1, 1]} : vector<144x128xf32> to vector<24x128xf32>
    %cst_16 = arith.constant dense<0.000000e+00> : vector<24x128xf32>
    %45 = tpu.matmul %38, %2, %cst_16 {dimension_numbers = #tpu.dot_dimension_numbers<[1], [0], [0], [1], [0, 0, 1, 1], [], []>} : vector<24x32xf32>, vector<32x128xf32>, vector<24x128xf32> -> vector<24x128xf32>
    %46 = arith.addf %44, %45 : vector<24x128xf32>
    %47 = vector.extract_strided_slice %46 {offsets = [0, 0], sizes = [24, 32], strides = [1, 1]} : vector<24x128xf32> to vector<24x32xf32>
    %48 = arith.negf %47 : vector<24x32xf32>
    %49 = math.exp %48 : vector<24x32xf32>
    %cst_17 = arith.constant 1.000000e+00 : f32
    %50 = vector.broadcast %cst_17 : f32 to vector<24x32xf32>
    %51 = arith.addf %50, %49 : vector<24x32xf32>
    %52 = arith.divf %50, %51 : vector<24x32xf32>
    %53 = vector.extract_strided_slice %46 {offsets = [0, 32], sizes = [24, 32], strides = [1, 1]} : vector<24x128xf32> to vector<24x32xf32>
    %54 = arith.negf %53 : vector<24x32xf32>
    %55 = math.exp %54 : vector<24x32xf32>
    %cst_18 = arith.constant 1.000000e+00 : f32
    %56 = vector.broadcast %cst_18 : f32 to vector<24x32xf32>
    %57 = arith.addf %56, %55 : vector<24x32xf32>
    %58 = arith.divf %56, %57 : vector<24x32xf32>
    %59 = vector.extract_strided_slice %46 {offsets = [0, 64], sizes = [24, 32], strides = [1, 1]} : vector<24x128xf32> to vector<24x32xf32>
    %60 = math.tanh %59 : vector<24x32xf32>
    %61 = vector.extract_strided_slice %46 {offsets = [0, 96], sizes = [24, 32], strides = [1, 1]} : vector<24x128xf32> to vector<24x32xf32>
    %62 = arith.negf %61 : vector<24x32xf32>
    %63 = math.exp %62 : vector<24x32xf32>
    %cst_19 = arith.constant 1.000000e+00 : f32
    %64 = vector.broadcast %cst_19 : f32 to vector<24x32xf32>
    %65 = arith.addf %64, %63 : vector<24x32xf32>
    %66 = arith.divf %64, %65 : vector<24x32xf32>
    %67 = arith.mulf %58, %36 : vector<24x32xf32>
    %68 = arith.mulf %52, %60 : vector<24x32xf32>
    %69 = arith.addf %67, %68 : vector<24x32xf32>
    %70 = math.tanh %69 : vector<24x32xf32>
    %71 = arith.mulf %66, %70 : vector<24x32xf32>
    %c1_i32 = arith.constant 1 : i32
    %72 = vector.broadcast %c1_i32 : i32 to vector<24x1xi32>
    %73 = arith.cmpi sgt, %0, %72 : vector<24x1xi32>
    %74 = vector.shape_cast %73 : vector<24x1xi1> to vector<24x1xi1>
    %75 = vector.broadcast %74 : vector<24x1xi1> to vector<24x32xi1>
    %76 = arith.select %75, %71, %43 : vector<24x32xi1>, vector<24x32xf32>
    %77 = vector.extract_strided_slice %7 {offsets = [48, 0], sizes = [24, 128], strides = [1, 1]} : vector<144x128xf32> to vector<24x128xf32>
    %cst_20 = arith.constant dense<0.000000e+00> : vector<24x128xf32>
    %78 = tpu.matmul %71, %2, %cst_20 {dimension_numbers = #tpu.dot_dimension_numbers<[1], [0], [0], [1], [0, 0, 1, 1], [], []>} : vector<24x32xf32>, vector<32x128xf32>, vector<24x128xf32> -> vector<24x128xf32>
    %79 = arith.addf %77, %78 : vector<24x128xf32>
    %80 = vector.extract_strided_slice %79 {offsets = [0, 0], sizes = [24, 32], strides = [1, 1]} : vector<24x128xf32> to vector<24x32xf32>
    %81 = arith.negf %80 : vector<24x32xf32>
    %82 = math.exp %81 : vector<24x32xf32>
    %cst_21 = arith.constant 1.000000e+00 : f32
    %83 = vector.broadcast %cst_21 : f32 to vector<24x32xf32>
    %84 = arith.addf %83, %82 : vector<24x32xf32>
    %85 = arith.divf %83, %84 : vector<24x32xf32>
    %86 = vector.extract_strided_slice %79 {offsets = [0, 32], sizes = [24, 32], strides = [1, 1]} : vector<24x128xf32> to vector<24x32xf32>
    %87 = arith.negf %86 : vector<24x32xf32>
    %88 = math.exp %87 : vector<24x32xf32>
    %cst_22 = arith.constant 1.000000e+00 : f32
    %89 = vector.broadcast %cst_22 : f32 to vector<24x32xf32>
    %90 = arith.addf %89, %88 : vector<24x32xf32>
    %91 = arith.divf %89, %90 : vector<24x32xf32>
    %92 = vector.extract_strided_slice %79 {offsets = [0, 64], sizes = [24, 32], strides = [1, 1]} : vector<24x128xf32> to vector<24x32xf32>
    %93 = math.tanh %92 : vector<24x32xf32>
    %94 = vector.extract_strided_slice %79 {offsets = [0, 96], sizes = [24, 32], strides = [1, 1]} : vector<24x128xf32> to vector<24x32xf32>
    %95 = arith.negf %94 : vector<24x32xf32>
    %96 = math.exp %95 : vector<24x32xf32>
    %cst_23 = arith.constant 1.000000e+00 : f32
    %97 = vector.broadcast %cst_23 : f32 to vector<24x32xf32>
    %98 = arith.addf %97, %96 : vector<24x32xf32>
    %99 = arith.divf %97, %98 : vector<24x32xf32>
    %100 = arith.mulf %91, %69 : vector<24x32xf32>
    %101 = arith.mulf %85, %93 : vector<24x32xf32>
    %102 = arith.addf %100, %101 : vector<24x32xf32>
    %103 = math.tanh %102 : vector<24x32xf32>
    %104 = arith.mulf %99, %103 : vector<24x32xf32>
    %c2_i32 = arith.constant 2 : i32
    %105 = vector.broadcast %c2_i32 : i32 to vector<24x1xi32>
    %106 = arith.cmpi sgt, %0, %105 : vector<24x1xi32>
    %107 = vector.shape_cast %106 : vector<24x1xi1> to vector<24x1xi1>
    %108 = vector.broadcast %107 : vector<24x1xi1> to vector<24x32xi1>
    %109 = arith.select %108, %104, %76 : vector<24x32xi1>, vector<24x32xf32>
    %110 = vector.extract_strided_slice %7 {offsets = [72, 0], sizes = [24, 128], strides = [1, 1]} : vector<144x128xf32> to vector<24x128xf32>
    %cst_24 = arith.constant dense<0.000000e+00> : vector<24x128xf32>
    %111 = tpu.matmul %104, %2, %cst_24 {dimension_numbers = #tpu.dot_dimension_numbers<[1], [0], [0], [1], [0, 0, 1, 1], [], []>} : vector<24x32xf32>, vector<32x128xf32>, vector<24x128xf32> -> vector<24x128xf32>
    %112 = arith.addf %110, %111 : vector<24x128xf32>
    %113 = vector.extract_strided_slice %112 {offsets = [0, 0], sizes = [24, 32], strides = [1, 1]} : vector<24x128xf32> to vector<24x32xf32>
    %114 = arith.negf %113 : vector<24x32xf32>
    %115 = math.exp %114 : vector<24x32xf32>
    %cst_25 = arith.constant 1.000000e+00 : f32
    %116 = vector.broadcast %cst_25 : f32 to vector<24x32xf32>
    %117 = arith.addf %116, %115 : vector<24x32xf32>
    %118 = arith.divf %116, %117 : vector<24x32xf32>
    %119 = vector.extract_strided_slice %112 {offsets = [0, 32], sizes = [24, 32], strides = [1, 1]} : vector<24x128xf32> to vector<24x32xf32>
    %120 = arith.negf %119 : vector<24x32xf32>
    %121 = math.exp %120 : vector<24x32xf32>
    %cst_26 = arith.constant 1.000000e+00 : f32
    %122 = vector.broadcast %cst_26 : f32 to vector<24x32xf32>
    %123 = arith.addf %122, %121 : vector<24x32xf32>
    %124 = arith.divf %122, %123 : vector<24x32xf32>
    %125 = vector.extract_strided_slice %112 {offsets = [0, 64], sizes = [24, 32], strides = [1, 1]} : vector<24x128xf32> to vector<24x32xf32>
    %126 = math.tanh %125 : vector<24x32xf32>
    %127 = vector.extract_strided_slice %112 {offsets = [0, 96], sizes = [24, 32], strides = [1, 1]} : vector<24x128xf32> to vector<24x32xf32>
    %128 = arith.negf %127 : vector<24x32xf32>
    %129 = math.exp %128 : vector<24x32xf32>
    %cst_27 = arith.constant 1.000000e+00 : f32
    %130 = vector.broadcast %cst_27 : f32 to vector<24x32xf32>
    %131 = arith.addf %130, %129 : vector<24x32xf32>
    %132 = arith.divf %130, %131 : vector<24x32xf32>
    %133 = arith.mulf %124, %102 : vector<24x32xf32>
    %134 = arith.mulf %118, %126 : vector<24x32xf32>
    %135 = arith.addf %133, %134 : vector<24x32xf32>
    %136 = math.tanh %135 : vector<24x32xf32>
    %137 = arith.mulf %132, %136 : vector<24x32xf32>
    %c3_i32 = arith.constant 3 : i32
    %138 = vector.broadcast %c3_i32 : i32 to vector<24x1xi32>
    %139 = arith.cmpi sgt, %0, %138 : vector<24x1xi32>
    %140 = vector.shape_cast %139 : vector<24x1xi1> to vector<24x1xi1>
    %141 = vector.broadcast %140 : vector<24x1xi1> to vector<24x32xi1>
    %142 = arith.select %141, %137, %109 : vector<24x32xi1>, vector<24x32xf32>
    %143 = vector.extract_strided_slice %7 {offsets = [96, 0], sizes = [24, 128], strides = [1, 1]} : vector<144x128xf32> to vector<24x128xf32>
    %cst_28 = arith.constant dense<0.000000e+00> : vector<24x128xf32>
    %144 = tpu.matmul %137, %2, %cst_28 {dimension_numbers = #tpu.dot_dimension_numbers<[1], [0], [0], [1], [0, 0, 1, 1], [], []>} : vector<24x32xf32>, vector<32x128xf32>, vector<24x128xf32> -> vector<24x128xf32>
    %145 = arith.addf %143, %144 : vector<24x128xf32>
    %146 = vector.extract_strided_slice %145 {offsets = [0, 0], sizes = [24, 32], strides = [1, 1]} : vector<24x128xf32> to vector<24x32xf32>
    %147 = arith.negf %146 : vector<24x32xf32>
    %148 = math.exp %147 : vector<24x32xf32>
    %cst_29 = arith.constant 1.000000e+00 : f32
    %149 = vector.broadcast %cst_29 : f32 to vector<24x32xf32>
    %150 = arith.addf %149, %148 : vector<24x32xf32>
    %151 = arith.divf %149, %150 : vector<24x32xf32>
    %152 = vector.extract_strided_slice %145 {offsets = [0, 32], sizes = [24, 32], strides = [1, 1]} : vector<24x128xf32> to vector<24x32xf32>
    %153 = arith.negf %152 : vector<24x32xf32>
    %154 = math.exp %153 : vector<24x32xf32>
    %cst_30 = arith.constant 1.000000e+00 : f32
    %155 = vector.broadcast %cst_30 : f32 to vector<24x32xf32>
    %156 = arith.addf %155, %154 : vector<24x32xf32>
    %157 = arith.divf %155, %156 : vector<24x32xf32>
    %158 = vector.extract_strided_slice %145 {offsets = [0, 64], sizes = [24, 32], strides = [1, 1]} : vector<24x128xf32> to vector<24x32xf32>
    %159 = math.tanh %158 : vector<24x32xf32>
    %160 = vector.extract_strided_slice %145 {offsets = [0, 96], sizes = [24, 32], strides = [1, 1]} : vector<24x128xf32> to vector<24x32xf32>
    %161 = arith.negf %160 : vector<24x32xf32>
    %162 = math.exp %161 : vector<24x32xf32>
    %cst_31 = arith.constant 1.000000e+00 : f32
    %163 = vector.broadcast %cst_31 : f32 to vector<24x32xf32>
    %164 = arith.addf %163, %162 : vector<24x32xf32>
    %165 = arith.divf %163, %164 : vector<24x32xf32>
    %166 = arith.mulf %157, %135 : vector<24x32xf32>
    %167 = arith.mulf %151, %159 : vector<24x32xf32>
    %168 = arith.addf %166, %167 : vector<24x32xf32>
    %169 = math.tanh %168 : vector<24x32xf32>
    %170 = arith.mulf %165, %169 : vector<24x32xf32>
    %c4_i32 = arith.constant 4 : i32
    %171 = vector.broadcast %c4_i32 : i32 to vector<24x1xi32>
    %172 = arith.cmpi sgt, %0, %171 : vector<24x1xi32>
    %173 = vector.shape_cast %172 : vector<24x1xi1> to vector<24x1xi1>
    %174 = vector.broadcast %173 : vector<24x1xi1> to vector<24x32xi1>
    %175 = arith.select %174, %170, %142 : vector<24x32xi1>, vector<24x32xf32>
    %176 = vector.extract_strided_slice %7 {offsets = [120, 0], sizes = [24, 128], strides = [1, 1]} : vector<144x128xf32> to vector<24x128xf32>
    %cst_32 = arith.constant dense<0.000000e+00> : vector<24x128xf32>
    %177 = tpu.matmul %170, %2, %cst_32 {dimension_numbers = #tpu.dot_dimension_numbers<[1], [0], [0], [1], [0, 0, 1, 1], [], []>} : vector<24x32xf32>, vector<32x128xf32>, vector<24x128xf32> -> vector<24x128xf32>
    %178 = arith.addf %176, %177 : vector<24x128xf32>
    %179 = vector.extract_strided_slice %178 {offsets = [0, 0], sizes = [24, 32], strides = [1, 1]} : vector<24x128xf32> to vector<24x32xf32>
    %180 = arith.negf %179 : vector<24x32xf32>
    %181 = math.exp %180 : vector<24x32xf32>
    %cst_33 = arith.constant 1.000000e+00 : f32
    %182 = vector.broadcast %cst_33 : f32 to vector<24x32xf32>
    %183 = arith.addf %182, %181 : vector<24x32xf32>
    %184 = arith.divf %182, %183 : vector<24x32xf32>
    %185 = vector.extract_strided_slice %178 {offsets = [0, 32], sizes = [24, 32], strides = [1, 1]} : vector<24x128xf32> to vector<24x32xf32>
    %186 = arith.negf %185 : vector<24x32xf32>
    %187 = math.exp %186 : vector<24x32xf32>
    %cst_34 = arith.constant 1.000000e+00 : f32
    %188 = vector.broadcast %cst_34 : f32 to vector<24x32xf32>
    %189 = arith.addf %188, %187 : vector<24x32xf32>
    %190 = arith.divf %188, %189 : vector<24x32xf32>
    %191 = vector.extract_strided_slice %178 {offsets = [0, 64], sizes = [24, 32], strides = [1, 1]} : vector<24x128xf32> to vector<24x32xf32>
    %192 = math.tanh %191 : vector<24x32xf32>
    %193 = vector.extract_strided_slice %178 {offsets = [0, 96], sizes = [24, 32], strides = [1, 1]} : vector<24x128xf32> to vector<24x32xf32>
    %194 = arith.negf %193 : vector<24x32xf32>
    %195 = math.exp %194 : vector<24x32xf32>
    %cst_35 = arith.constant 1.000000e+00 : f32
    %196 = vector.broadcast %cst_35 : f32 to vector<24x32xf32>
    %197 = arith.addf %196, %195 : vector<24x32xf32>
    %198 = arith.divf %196, %197 : vector<24x32xf32>
    %199 = arith.mulf %190, %168 : vector<24x32xf32>
    %200 = arith.mulf %184, %192 : vector<24x32xf32>
    %201 = arith.addf %199, %200 : vector<24x32xf32>
    %202 = math.tanh %201 : vector<24x32xf32>
    %203 = arith.mulf %198, %202 : vector<24x32xf32>
    %c5_i32 = arith.constant 5 : i32
    %204 = vector.broadcast %c5_i32 : i32 to vector<24x1xi32>
    %205 = arith.cmpi sgt, %0, %204 : vector<24x1xi32>
    %206 = vector.shape_cast %205 : vector<24x1xi1> to vector<24x1xi1>
    %207 = vector.broadcast %206 : vector<24x1xi1> to vector<24x32xi1>
    %208 = arith.select %207, %203, %175 : vector<24x32xi1>, vector<24x32xf32>
    %c0_36 = arith.constant 0 : index
    %c0_37 = arith.constant 0 : index
    %209 = vector.load %arg0[%c0_36, %c0_37] : memref<16x16xf32, #tpu.memory_space<vmem>>, vector<16x16xf32>
    %c0_38 = arith.constant 0 : index
    %c0_39 = arith.constant 0 : index
    %210 = vector.load %arg10[%c0_38, %c0_39] : memref<16x32xf32, #tpu.memory_space<vmem>>, vector<16x32xf32>
    %cst_40 = arith.constant dense<0.000000e+00> : vector<16x32xf32>
    %211 = tpu.matmul %209, %210, %cst_40 {dimension_numbers = #tpu.dot_dimension_numbers<[1], [0], [0], [1], [0, 0, 1, 1], [], []>} : vector<16x16xf32>, vector<16x32xf32>, vector<16x32xf32> -> vector<16x32xf32>
    %c0_41 = arith.constant 0 : index
    %c0_42 = arith.constant 0 : index
    %212 = vector.load %arg6[%c0_41, %c0_42] : memref<24x16xf32, #tpu.memory_space<vmem>>, vector<24x16xf32>
    %cst_43 = arith.constant dense<0.000000e+00> : vector<24x32xf32>
    %213 = tpu.matmul %212, %211, %cst_43 {dimension_numbers = #tpu.dot_dimension_numbers<[1], [0], [0], [1], [0, 0, 1, 1], [], []>} : vector<24x16xf32>, vector<16x32xf32>, vector<24x32xf32> -> vector<24x32xf32>
    %c0_44 = arith.constant 0 : index
    %c0_45 = arith.constant 0 : index
    %214 = vector.load %arg12[%c0_44, %c0_45] : memref<32x32xf32, #tpu.memory_space<vmem>>, vector<32x32xf32>
    %cst_46 = arith.constant dense<0.000000e+00> : vector<24x32xf32>
    %215 = tpu.matmul %208, %214, %cst_46 {dimension_numbers = #tpu.dot_dimension_numbers<[1], [0], [0], [1], [0, 0, 1, 1], [], []>} : vector<24x32xf32>, vector<32x32xf32>, vector<24x32xf32> -> vector<24x32xf32>
    %216 = arith.addf %213, %215 : vector<24x32xf32>
    %c0_47 = arith.constant 0 : index
    %c0_48 = arith.constant 0 : index
    %217 = vector.load %arg13[%c0_47, %c0_48] : memref<1x32xf32, #tpu.memory_space<vmem>>, vector<1x32xf32>
    %218 = vector.broadcast %217 : vector<1x32xf32> to vector<24x32xf32>
    %219 = arith.addf %216, %218 : vector<24x32xf32>
    %cst_49 = arith.constant 0.000000e+00 : f32
    %220 = vector.broadcast %cst_49 : f32 to vector<24x32xf32>
    %221 = arith.maximumf %219, %220 : vector<24x32xf32>
    %c0_50 = arith.constant 0 : index
    %c0_51 = arith.constant 0 : index
    %222 = vector.load %arg8[%c0_50, %c0_51] : memref<8x24xf32, #tpu.memory_space<vmem>>, vector<8x24xf32>
    %cst_52 = arith.constant dense<0.000000e+00> : vector<8x32xf32>
    %223 = tpu.matmul %222, %221, %cst_52 {dimension_numbers = #tpu.dot_dimension_numbers<[1], [0], [0], [1], [0, 0, 1, 1], [], []>} : vector<8x24xf32>, vector<24x32xf32>, vector<8x32xf32> -> vector<8x32xf32>
    %c0_53 = arith.constant 0 : index
    %c0_54 = arith.constant 0 : index
    %224 = vector.load %arg7[%c0_53, %c0_54] : memref<8x16xf32, #tpu.memory_space<vmem>>, vector<8x16xf32>
    %cst_55 = arith.constant dense<0.000000e+00> : vector<8x16xf32>
    %225 = tpu.matmul %224, %209, %cst_55 {dimension_numbers = #tpu.dot_dimension_numbers<[1], [0], [0], [1], [0, 0, 1, 1], [], []>} : vector<8x16xf32>, vector<16x16xf32>, vector<8x16xf32> -> vector<8x16xf32>
    %c0_56 = arith.constant 0 : index
    %c0_57 = arith.constant 0 : index
    %226 = vector.load %arg11[%c0_56, %c0_57] : memref<16x32xf32, #tpu.memory_space<vmem>>, vector<16x32xf32>
    %cst_58 = arith.constant dense<0.000000e+00> : vector<8x32xf32>
    %227 = tpu.matmul %225, %226, %cst_58 {dimension_numbers = #tpu.dot_dimension_numbers<[1], [0], [0], [1], [0, 0, 1, 1], [], []>} : vector<8x16xf32>, vector<16x32xf32>, vector<8x32xf32> -> vector<8x32xf32>
    %c0_59 = arith.constant 0 : index
    %c0_60 = arith.constant 0 : index
    %228 = vector.load %arg13[%c0_59, %c0_60] : memref<1x32xf32, #tpu.memory_space<vmem>>, vector<1x32xf32>
    %229 = vector.broadcast %228 : vector<1x32xf32> to vector<8x32xf32>
    %230 = arith.addf %227, %229 : vector<8x32xf32>
    %231 = arith.subf %223, %230 : vector<8x32xf32>
    %c0_61 = arith.constant 0 : index
    %c0_62 = arith.constant 0 : index
    %232 = vector.load %arg9[%c0_61, %c0_62] : memref<8x1xf32, #tpu.memory_space<vmem>>, vector<8x1xf32>
    %233 = vector.broadcast %232 : vector<8x1xf32> to vector<8x32xf32>
    %234 = arith.mulf %231, %233 : vector<8x32xf32>
    %c0_63 = arith.constant 0 : index
    %c0_64 = arith.constant 0 : index
    %235 = vector.load %arg14[%c0_63, %c0_64] : memref<16x32xf32, #tpu.memory_space<vmem>>, vector<16x32xf32>
    %cst_65 = arith.constant dense<0.000000e+00> : vector<8x32xf32>
    %236 = tpu.matmul %225, %235, %cst_65 {dimension_numbers = #tpu.dot_dimension_numbers<[1], [0], [0], [1], [0, 0, 1, 1], [], []>} : vector<8x16xf32>, vector<16x32xf32>, vector<8x32xf32> -> vector<8x32xf32>
    %c0_66 = arith.constant 0 : index
    %c0_67 = arith.constant 0 : index
    %237 = vector.load %arg15[%c0_66, %c0_67] : memref<32x32xf32, #tpu.memory_space<vmem>>, vector<32x32xf32>
    %cst_68 = arith.constant dense<0.000000e+00> : vector<8x32xf32>
    %238 = tpu.matmul %234, %237, %cst_68 {dimension_numbers = #tpu.dot_dimension_numbers<[1], [0], [0], [1], [0, 0, 1, 1], [], []>} : vector<8x32xf32>, vector<32x32xf32>, vector<8x32xf32> -> vector<8x32xf32>
    %239 = arith.addf %236, %238 : vector<8x32xf32>
    %c0_69 = arith.constant 0 : index
    %c0_70 = arith.constant 0 : index
    %240 = vector.load %arg16[%c0_69, %c0_70] : memref<1x32xf32, #tpu.memory_space<vmem>>, vector<1x32xf32>
    %241 = vector.broadcast %240 : vector<1x32xf32> to vector<8x32xf32>
    %242 = arith.addf %239, %241 : vector<8x32xf32>
    %cst_71 = arith.constant 0.000000e+00 : f32
    %243 = vector.broadcast %cst_71 : f32 to vector<8x32xf32>
    %244 = arith.maximumf %242, %243 : vector<8x32xf32>
    %c0_72 = arith.constant 0 : index
    %c0_73 = arith.constant 0 : index
    %245 = vector.load %arg17[%c0_72, %c0_73] : memref<8x32xf32, #tpu.memory_space<vmem>>, vector<8x32xf32>
    tpu.vector_store %arg17[%c0_72, %c0_73], %244 {strides = array<i32>} : memref<8x32xf32, #tpu.memory_space<vmem>>, vector<8x32xf32>,
    return
  }
}

</mosaic_0001>

<bundles_post_ra>
// kernel: tpu_custom_call.1
= control target key start
LH: loop header
LB: loop body
LE: loop exit
PB: predicated region body
PF: predicated region fallthrough
CT: control target
= control target key end

     0   :  { %s2400_s0 = inlined_call_operand.vmem [shape: f32[16,16], index: 0, kind: input, shape index: {}]   ;;  %s2401_s1 = inlined_call_operand.vmem [shape: f32[144,8], index: 1, kind: input, shape index: {}]   ;;  %s2402_s2 = inlined_call_operand.vmem [shape: s32[24,1], index: 2, kind: input, shape index: {}]   ;;  %s2403_s3 = inlined_call_operand.vmem [shape: f32[8,128], index: 3, kind: input, shape index: {}]   ;;  %s2404_s4 = inlined_call_operand.vmem [shape: f32[32,128], index: 4, kind: input, shape index: {}]   ;;  %s2405_s5 = inlined_call_operand.vmem [shape: f32[1,128], index: 5, kind: input, shape index: {}]   ;;  %s2406_s6 = inlined_call_operand.vmem [shape: f32[24,16], index: 6, kind: input, shape index: {}]   ;;  %s2407_s7 = inlined_call_operand.vmem [shape: f32[8,16], index: 7, kind: input, shape index: {}]   ;;  %s2408_s8 = inlined_call_operand.vmem [shape: f32[8,24], index: 8, kind: input, shape index: {}]   ;;  %s2409_s9 = inlined_call_operand.vmem [shape: f32[8,1], index: 9, kind: input, shape index: {}]   ;;  %s2410_s10 = inlined_call_operand.vmem [shape: f32[16,32], index: 10, kind: input, shape index: {}]   ;;  %s2411_s11 = inlined_call_operand.vmem [shape: f32[16,32], index: 11, kind: input, shape index: {}]   ;;  %s2412_s12 = inlined_call_operand.vmem [shape: f32[32,32], index: 12, kind: input, shape index: {}]   ;;  %s2413_s13 = inlined_call_operand.vmem [shape: f32[1,32], index: 13, kind: input, shape index: {}]   ;;  %s2414_s14 = inlined_call_operand.vmem [shape: f32[16,32], index: 14, kind: input, shape index: {}]   ;;  %s2415_s15 = inlined_call_operand.vmem [shape: f32[32,32], index: 15, kind: input, shape index: {}]   ;;  %s2416_s16 = inlined_call_operand.vmem [shape: f32[1,32], index: 16, kind: input, shape index: {}]   ;;  %s2417_s17 = inlined_call_operand.hbm [shape: f32[8,32], index: 17, kind: output, shape index: {}]  }
   0x1   :  { %2420 = sst [smem:[#allocation5_spill]] %s2400_s0 }
   0x2   :  { %2421 = sst [smem:[#allocation6_spill]] %s2401_s1 }
   0x3   :  { %v1885_v0 = vld [vmem:[%s2404_s4 + $0x18] sm:$0xff]  ;;  %v1890_v1 = vld [vmem:[%s2404_s4 + $0x10] sm:$0xff]  ;;  %v82_v2 = vld [vmem:[%s2403_s3] sm:$0xff]  ;;  %vm87_vm0 = vcmask 64512   ;;  %s2422_s18 = sld [smem:[#allocation6_spill]] }
   0x4   :  { %229 = vmatpush.msra.mxu1 %v1885_v0  ;;  %157 = vmatpush.msra.mxu0 %v82_v2  ;;  %v1902_v4 = vld [vmem:[%s2404_s4 + $0x8] sm:$0xff]  ;;  %v1910_v5 = vld [vmem:[%s2404_s4] sm:$0xff] }
   0x5   :  { %1603 = vmatpush.msra.mxu2 %v82_v2  ;;  %1604 = vmatpush.msra.mxu3 %v82_v2 }
   0x6   :  { %230 = vmatpush.msra.mxu1 %v1890_v1 }
   0x7   :  { %405 = vmatpush.msrb.mxu2 %v1885_v0 }
   0x9   :  { %v60_v3 = vld [vmem:[%s2422_s18] sm:$0xff] }
   0xa   :  { %1539 = vmatmul.msk.f32.vlgmr.msra.gmra.mxu0 %vm87_vm0, %v60_v3 }
   0xb   :  { %22 = vsyncpa [#allocation3], 0  ;;  %231 = vmatpush.msra.mxu1 %v1902_v4  ;;  %406 = vmatpush.msrb.mxu2 %v1890_v1  ;;  %v61_v6 = vld [vmem:[%s2422_s18 + $0x8] sm:$0xff]  ;;  %v1787_v7 = vmov 0.0   ;;  %v62_v8 = vld [vmem:[%s2422_s18 + $0x10] sm:$0xff]  ;;  %s1788_s26 = smov 64  }
   0xc   :  { %581 = vmatpush.msrb.mxu3 %v1885_v0  ;;  %v1936_v9 = vld [vmem:[%s2405_s5] ss:$0 sm:$0xff]  ;;  %s1789_s27 = smov 32   ;;  %vm213_vm13 = vcmask 261120   ;;  %s2423_s24 = sld [smem:[#allocation5_spill]] }
   0xd   :  { %232 = vmatpush.msra.mxu1 %v1910_v5  ;;  %407 = vmatpush.msrb.mxu2 %v1902_v4 }
   0xe   :  { %233 = vmatmul.f32.vlgmr.msra.gmra.mxu1 %v1787_v7  ;;  %582 = vmatpush.msrb.mxu3 %v1890_v1 }
   0xf   :  { %408 = vmatpush.msrb.mxu2 %v1910_v5  ;;  %757 = vmatpush.msrb.mxu1 %v1885_v0 }
  0x10   :  { %583 = vmatpush.msrb.mxu3 %v1902_v4 }
  0x11   :  { %758 = vmatpush.msrb.mxu1 %v1890_v1 }
  0x12   :  { %1540 = vmatmul.msk.f32.gmra.mxu0 %vm87_vm0, %v61_v6  ;;  %584 = vmatpush.msrb.mxu3 %v1910_v5 }
  0x13   :  { %759 = vmatpush.msrb.mxu1 %v1902_v4 }
  0x15   :  { %760 = vmatpush.msrb.mxu1 %v1910_v5 }
  0x16   :  { %236 = vmatmul.f32.gmra.mxu1 %v1787_v7 }
  0x1a   :  { %1541 = vmatmul.msk.f32.gmra.mxu0 %vm87_vm0, %v62_v8 }
  0x1e   :  { %239 = vmatmul.f32.gmra.mxu1 %v1787_v7 }
  0x87   :  { %v159_v10 = vpop.f32.mrf.mxu0 }
  0x88   :  { %v160_v11 = vadd.f32 %v1936_v9, %v159_v10 }
  0x8b   :  { %v234_v12 = vpop.f32.mrf.mxu1 }
  0x8c   :  { %v243_v13 = vadd.f32 %v234_v12, %v160_v11 }
  0x8e   :  { %1616 = vtanh.f32 %v243_v13  ;;  %v1557_v25 = vmul.f32 -1.442695, %v243_v13 }
  0x8f   :  { %v162_v14 = vpop.f32.mrf.mxu0 }
  0x90   :  { %v163_v15 = vadd.f32 %v1936_v9, %v162_v14 }
  0x93   :  { %v237_v16 = vpop.f32.mrf.mxu1 }
  0x94   :  { %v1617_v17 = vpop.eup %1616  ;;  %v244_v18 = vadd.f32 %v237_v16, %v163_v15 }
  0x95   :  { %312 = vrot.lane.b32.xlu0 %v1617_v17, %s1788_s26 }
  0x96   :  { %1618 = vtanh.f32 %v244_v18  ;;  %v1558_v26 = vmul.f32 -1.442695, %v244_v18 }
  0x97   :  { %v165_v19 = vpop.f32.mrf.mxu0 }
  0x98   :  { %v166_v20 = vadd.f32 %v1936_v9, %v165_v19 }
  0x9b   :  { %v240_v21 = vpop.f32.mrf.mxu1 }
  0x9c   :  { %v1619_v22 = vpop.eup %1618  ;;  %v245_v23 = vadd.f32 %v240_v21, %v166_v20 }
  0x9d   :  { %314 = vrot.lane.b32.xlu0 %v1619_v22, %s1788_s26 }
  0x9e   :  { %1620 = vtanh.f32 %v245_v23  ;;  %v1559_v29 = vmul.f32 -1.442695, %v245_v23 }
  0x9f   :  { %1622 = vpow2.f32 %v1557_v25 }
  0xa0   :  { %1624 = vpow2.f32 %v1558_v26 }
  0xa4   :  { %v1621_v24 = vpop.eup %1620 }
  0xa5   :  { %316 = vrot.lane.b32.xlu1 %v1621_v24, %s1788_s26  ;;  %v1623_v27 = vpop.eup %1622 }
  0xa6   :  { %v255_v28 = vadd.f32 1.0, %v1623_v27  ;;  %v1625_v30 = vpop.eup %1624 }
  0xa7   :  { %v256_v31 = vadd.f32 1.0, %v1625_v30  ;;  %v74_v30 = vld [vmem:[%s2422_s18 + $0x70] sm:$0xff] }
  0xa8   :  { %1626 = vrcp.f32 %v255_v28  ;;  %v269_v43 = vand.u32 2147483648, %v255_v28  ;;  %vm263_vm2 = vweird.f32 %v255_v28  ;;  %v267_v44 = vand.u32 2147483647, %v255_v28 }
  0xa9   :  { %1628 = vpow2.f32 %v1559_v29  ;;  %vm278_vm5 = vweird.f32 %v256_v31  ;;  %v284_v51 = vand.u32 2147483648, %v256_v31  ;;  %v282_v54 = vand.u32 2147483647, %v256_v31  ;;  %v73_v29 = vld [vmem:[%s2422_s18 + $0x68] sm:$0xff] }
  0xaa   :  { %1630 = vrcp.f32 %v256_v31  ;;  %v270_v48 = vor.u32 1.1754944e-38, %v269_v43  ;;  %vm268_vm4 = vcmp.eq.f32.partialorder %v267_v44, 8.507059e+37  ;;  %1552 = vmatmul.msk.f32.vlgmr.msra.gmra.mxu2 %vm87_vm0, %v73_v29 }
  0xab   :  { %v285_v56 = vor.u32 1.1754944e-38, %v284_v51  ;;  %vm283_vm8 = vcmp.eq.f32.partialorder %v282_v54, 8.507059e+37  ;;  %933 = vmatpush.msra.mxu2 %v1885_v0 }
  0xad   :  { %934 = vmatpush.msra.mxu2 %v1890_v1 }
  0xae   :  { %v1627_v32 = vpop.eup %1626 }
  0xaf   :  { %v1629_v33 = vpop.eup %1628  ;;  %v259_v34 = vmul.f32 %v1627_v32, %v255_v28  ;;  %vm264_vm1 = vweird.f32 %v1627_v32  ;;  %935 = vmatpush.msra.mxu2 %v1902_v4 }
  0xb0   :  { %v257_v35 = vadd.f32 1.0, %v1629_v33  ;;  %v1631_v37 = vpop.eup %1630  ;;  %vm265_vm3 = vmor %vm263_vm2, %vm264_vm1  ;;  %v64_v33 = vld [vmem:[%s2422_s18 + $0x20] sm:$0xff] }
  0xb1   :  { %v260_v36 = vsub.f32 1.0, %v259_v34  ;;  %v274_v39 = vmul.f32 %v1631_v37, %v256_v31  ;;  %vm279_vm6 = vweird.f32 %v1631_v37  ;;  %936 = vmatpush.msra.mxu2 %v1910_v5  ;;  %v75_v31 = vld [vmem:[%s2422_s18 + $0x78] sm:$0xff]  ;;  %v65_v34 = vld [vmem:[%s2422_s18 + $0x28] sm:$0xff] }
  0xb2   :  { %1632 = vrcp.f32 %v257_v35  ;;  %vm280_vm7 = vmor %vm278_vm5, %vm279_vm6  ;;  %vm293_vm9 = vweird.f32 %v257_v35  ;;  %v299_v61 = vand.u32 2147483648, %v257_v35  ;;  %v297_v2 = vand.u32 2147483647, %v257_v35  ;;  %1553 = vmatmul.msk.f32.gmra.mxu2 %vm87_vm0, %v74_v30 }
  0xb3   :  { %v261_v38 = vmul.f32 %v1627_v32, %v260_v36  ;;  %v275_v41 = vsub.f32 1.0, %v274_v39 }
  0xb4   :  { %v300_v3 = vor.u32 1.1754944e-38, %v299_v61  ;;  %vm298_vm12 = vcmp.eq.f32.partialorder %v297_v2, 8.507059e+37 }
  0xb5   :  { %v262_v40 = vadd.f32 %v1627_v32, %v261_v38  ;;  %v276_v46 = vmul.f32 %v1631_v37, %v275_v41 }
  0xb7   :  { %v266_v45 = vsel %vm265_vm3, %v1627_v32, %v262_v40  ;;  %v277_v53 = vadd.f32 %v1631_v37, %v276_v46  ;;  %v63_v32 = vld [vmem:[%s2422_s18 + $0x18] sm:$0xff] }
  0xb8   :  { %v1633_v42 = vpop.eup %1632  ;;  %v271_v50 = vsel %vm268_vm4, %v270_v48, %v266_v45  ;;  %1542 = vmatmul.msk.f32.gmra.mxu0 %vm87_vm0, %v63_v32 }
  0xb9   :  { %v289_v47 = vmul.f32 %v1633_v42, %v257_v35  ;;  %v281_v57 = vsel %vm280_vm7, %v1631_v37, %v277_v53  ;;  %vm294_vm10 = vweird.f32 %v1633_v42  ;;  %v306_v18 = vmul.f32 0.0, %v271_v50 }
  0xba   :  { %v286_v59 = vsel %vm283_vm8, %v285_v56, %v281_v57  ;;  %vm295_vm11 = vmor %vm293_vm9, %vm294_vm10  ;;  %1554 = vmatmul.msk.f32.gmra.mxu2 %vm87_vm0, %v75_v31 }
  0xbb   :  { %v290_v55 = vsub.f32 1.0, %v289_v47  ;;  %v307_v11 = vmul.f32 0.0, %v286_v59 }
  0xbd   :  { %v291_v58 = vmul.f32 %v1633_v42, %v290_v55 }
  0xbf   :  { %v292_v63 = vadd.f32 %v1633_v42, %v291_v58 }
  0xc0   :  { %1543 = vmatmul.msk.f32.gmra.mxu0 %vm87_vm0, %v64_v33 }
  0xc1   :  { %v296_v6 = vsel %vm295_vm11, %v1633_v42, %v292_v63 }
  0xc2   :  { %v301_v8 = vsel %vm298_vm12, %v300_v3, %v296_v6 }
  0xc3   :  { %v308_v14 = vmul.f32 0.0, %v301_v8 }
  0xc8   :  { %1544 = vmatmul.msk.f32.gmra.mxu0 %vm87_vm0, %v65_v34 }
 0x107   :  { %v313_v49 = vpop.permute.xlu0 %312 }
 0x108   :  { %v321_v52 = vmul.f32 %v313_v49, %v271_v50 }
 0x10a   :  { %327 = vrot.lane.b32.xlu1 %v321_v52, %s1789_s27 }
 0x10f   :  { %v315_v60 = vpop.permute.xlu0 %314 }
 0x110   :  { %v322_v62 = vmul.f32 %v315_v60, %v286_v59 }
 0x112   :  { %329 = vrot.lane.b32.xlu2 %v322_v62, %s1789_s27 }
 0x117   :  { %v317_v7 = vpop.permute.xlu1 %316 }
 0x118   :  { %v323_v10 = vmul.f32 %v317_v7, %v301_v8 }
 0x11a   :  { %331 = vrot.lane.b32.xlu2 %v323_v10, %s1789_s27 }
 0x12d   :  { %v2002_v38 = vpop.f32.mrf.mxu2 }
 0x135   :  { %v2004_v39 = vpop.f32.mrf.mxu2  ;;  %v168_v41 = vpop.f32.mrf.mxu0 }
 0x136   :  { %v169_v42 = vadd.f32 %v1936_v9, %v168_v41 }
 0x13d   :  { %v2006_v40 = vpop.f32.mrf.mxu2  ;;  %v171_v44 = vpop.f32.mrf.mxu0 }
 0x13e   :  { %v172_v46 = vadd.f32 %v1936_v9, %v171_v44 }
 0x16c   :  { %v330_v12 = vpop.permute.xlu2 %329 }
 0x16d   :  { %v1947_v13 = vadd.f32 %v330_v12, %v307_v11 }
 0x16f   :  { %1634 = vtanh.f32 %v1947_v13 }
 0x174   :  { %v332_v15 = vpop.permute.xlu2 %331 }
 0x175   :  { %v1635_v16 = vpop.eup %1634  ;;  %v1950_v17 = vadd.f32 %v332_v15, %v308_v14 }
 0x176   :  { %347 = vrot.lane.b32.xlu1 %v1635_v16, %s1788_s26 }
 0x177   :  { %1636 = vtanh.f32 %v1950_v17 }
 0x17c   :  { %v328_v19 = vpop.permute.xlu1 %327 }
 0x17d   :  { %v1637_v20 = vpop.eup %1636  ;;  %v1954_v21 = vadd.f32 %v328_v19, %v306_v18 }
 0x17e   :  { %349 = vrot.lane.b32.xlu2 %v1637_v20, %s1788_s26 }
 0x17f   :  { %1638 = vtanh.f32 %v1954_v21 }
 0x185   :  { %v1639_v22 = vpop.eup %1638 }
 0x186   :  { %345 = vrot.lane.b32.xlu0 %v1639_v22, %s1788_s26 }
 0x1d8   :  { %v350_v23 = vpop.permute.xlu2 %349 }
 0x1d9   :  { %v1959_v24 = vmul.f32 %v350_v23, %v301_v8 }
 0x1db   :  { %385 = vrot.lane.b32.xlu2 %v1959_v24, %s1789_s27 }
 0x1e8   :  { %v348_v25 = vpop.permute.xlu1 %347 }
 0x1e9   :  { %v1963_v26 = vmul.f32 %v348_v25, %v286_v59 }
 0x1eb   :  { %383 = vrot.lane.b32.xlu1 %v1963_v26, %s1789_s27 }
 0x1f8   :  { %v346_v27 = vpop.permute.xlu0 %345 }
 0x1f9   :  { %v1967_v28 = vmul.f32 %v346_v27, %v271_v50  ;;  %v174_v50 = vpop.f32.mrf.mxu0 }
 0x1fa   :  { %v175_v51 = vadd.f32 %v1936_v9, %v174_v50 }
 0x1fb   :  { %381 = vrot.lane.b32.xlu0 %v1967_v28, %s1789_s27 }
 0x235   :  { %v386_v37 = vpop.permute.xlu2 %385 }
 0x25d   :  { %v384_v36 = vpop.permute.xlu1 %383 }
 0x26d   :  { %v382_v35 = vpop.permute.xlu0 %381 }
 0x26e   :  { %1560 = vmatmul.msk.f32.vlgmr.msrb.gmra.mxu2 %vm213_vm13, %v382_v35 }
 0x276   :  { %1561 = vmatmul.msk.f32.gmra.mxu2 %vm213_vm13, %v384_v36 }
 0x27e   :  { %1562 = vmatmul.msk.f32.gmra.mxu2 %vm213_vm13, %v386_v37 }
 0x2f1   :  { %v410_v43 = vpop.f32.mrf.mxu2 }
 0x2f2   :  { %v419_v45 = vadd.f32 %v410_v43, %v169_v42 }
 0x2f4   :  { %1640 = vtanh.f32 %v419_v45  ;;  %v1563_v57 = vmul.f32 -1.442695, %v419_v45 }
 0x2f9   :  { %v413_v47 = vpop.f32.mrf.mxu2 }
 0x2fa   :  { %v1641_v48 = vpop.eup %1640  ;;  %v420_v49 = vadd.f32 %v413_v47, %v172_v46 }
 0x2fb   :  { %488 = vrot.lane.b32.xlu0 %v1641_v48, %s1788_s26 }
 0x2fc   :  { %1642 = vtanh.f32 %v420_v49  ;;  %v1564_v60 = vmul.f32 -1.442695, %v420_v49 }
 0x301   :  { %v416_v52 = vpop.f32.mrf.mxu2 }
 0x302   :  { %v1643_v53 = vpop.eup %1642  ;;  %v421_v54 = vadd.f32 %v416_v52, %v175_v51 }
 0x303   :  { %490 = vrot.lane.b32.xlu1 %v1643_v53, %s1788_s26 }
 0x304   :  { %1644 = vtanh.f32 %v421_v54  ;;  %v1565_v56 = vmul.f32 -1.442695, %v421_v54 }
 0x306   :  { %1646 = vpow2.f32 %v1565_v56 }
 0x307   :  { %1648 = vpow2.f32 %v1563_v57 }
 0x30a   :  { %v1645_v55 = vpop.eup %1644 }
 0x30b   :  { %492 = vrot.lane.b32.xlu2 %v1645_v55, %s1788_s26 }
 0x30c   :  { %v1647_v58 = vpop.eup %1646 }
 0x30d   :  { %v433_v59 = vadd.f32 1.0, %v1647_v58  ;;  %v1649_v61 = vpop.eup %1648 }
 0x30e   :  { %v431_v62 = vadd.f32 1.0, %v1649_v61 }
 0x30f   :  { %1650 = vrcp.f32 %v433_v59  ;;  %v475_v16 = vand.u32 2147483648, %v433_v59  ;;  %vm469_vm15 = vweird.f32 %v433_v59  ;;  %v473_v18 = vand.u32 2147483647, %v433_v59 }
 0x310   :  { %1652 = vpow2.f32 %v1564_v60  ;;  %v445_v32 = vand.u32 2147483648, %v431_v62  ;;  %vm439_vm4 = vweird.f32 %v431_v62  ;;  %v443_v33 = vand.u32 2147483647, %v431_v62 }
 0x311   :  { %1654 = vrcp.f32 %v431_v62  ;;  %v476_v23 = vor.u32 1.1754944e-38, %v475_v16  ;;  %vm474_vm2 = vcmp.eq.f32.partialorder %v473_v18, 8.507059e+37 }
 0x312   :  { %v446_v36 = vor.u32 1.1754944e-38, %v445_v32  ;;  %vm444_vm6 = vcmp.eq.f32.partialorder %v443_v33, 8.507059e+37 }
 0x315   :  { %v1651_v63 = vpop.eup %1650 }
 0x316   :  { %v1653_v2 = vpop.eup %1652  ;;  %v465_v3 = vmul.f32 %v1651_v63, %v433_v59  ;;  %vm470_vm14 = vweird.f32 %v1651_v63 }
 0x317   :  { %v432_v6 = vadd.f32 1.0, %v1653_v2  ;;  %v1655_v8 = vpop.eup %1654  ;;  %vm471_vm1 = vmor %vm469_vm15, %vm470_vm14 }
 0x318   :  { %v466_v7 = vsub.f32 1.0, %v465_v3  ;;  %v435_v11 = vmul.f32 %v1655_v8, %v431_v62  ;;  %vm440_vm3 = vweird.f32 %v1655_v8 }
 0x319   :  { %1656 = vrcp.f32 %v432_v6  ;;  %vm441_vm5 = vmor %vm439_vm4, %vm440_vm3  ;;  %v460_v44 = vand.u32 2147483648, %v432_v6  ;;  %vm454_vm8 = vweird.f32 %v432_v6  ;;  %v458_v45 = vand.u32 2147483647, %v432_v6 }
 0x31a   :  { %v467_v10 = vmul.f32 %v1651_v63, %v466_v7  ;;  %v436_v14 = vsub.f32 1.0, %v435_v11  ;;  %v77_v7 = vld [vmem:[%s2422_s18 + $0x88] sm:$0xff] }
 0x31b   :  { %v461_v47 = vor.u32 1.1754944e-38, %v460_v44  ;;  %vm459_vm10 = vcmp.eq.f32.partialorder %v458_v45, 8.507059e+37 }
 0x31c   :  { %v468_v12 = vadd.f32 %v1651_v63, %v467_v10  ;;  %v437_v20 = vmul.f32 %v1655_v8, %v436_v14 }
 0x31e   :  { %v472_v19 = vsel %vm471_vm1, %v1651_v63, %v468_v12  ;;  %v438_v30 = vadd.f32 %v1655_v8, %v437_v20 }
 0x31f   :  { %v1657_v15 = vpop.eup %1656  ;;  %v477_v27 = vsel %vm474_vm2, %v476_v23, %v472_v19 }
 0x320   :  { %v450_v22 = vmul.f32 %v1657_v15, %v432_v6  ;;  %v442_v34 = vsel %vm441_vm5, %v1655_v8, %v438_v30  ;;  %vm455_vm7 = vweird.f32 %v1657_v15  ;;  %v484_v51 = vmul.f32 %v477_v27, %v1950_v17 }
 0x321   :  { %v447_v41 = vsel %vm444_vm6, %v446_v36, %v442_v34  ;;  %vm456_vm9 = vmor %vm454_vm8, %vm455_vm7 }
 0x322   :  { %v451_v31 = vsub.f32 1.0, %v450_v22  ;;  %v482_v55 = vmul.f32 %v447_v41, %v1954_v21 }
 0x324   :  { %v452_v35 = vmul.f32 %v1657_v15, %v451_v31 }
 0x326   :  { %v453_v43 = vadd.f32 %v1657_v15, %v452_v35 }
 0x328   :  { %v457_v46 = vsel %vm456_vm9, %v1657_v15, %v453_v43 }
 0x329   :  { %v462_v49 = vsel %vm459_vm10, %v461_v47, %v457_v46 }
 0x32a   :  { %v483_v58 = vmul.f32 %v462_v49, %v1947_v13  ;;  %v76_v13 = vld [vmem:[%s2422_s18 + $0x80] sm:$0xff] }
 0x32b   :  { %1555 = vmatmul.msk.f32.vlgmr.msra.gmra.mxu3 %vm87_vm0, %v76_v13 }
 0x32c   :  { %1109 = vmatpush.msra.mxu3 %v1885_v0  ;;  %v66_v0 = vld [vmem:[%s2422_s18 + $0x30] sm:$0xff] }
 0x32d   :  { %1545 = vmatmul.msk.f32.gmra.mxu0 %vm87_vm0, %v66_v0 }
 0x32e   :  { %1110 = vmatpush.msra.mxu3 %v1890_v1  ;;  %v67_v1 = vld [vmem:[%s2422_s18 + $0x38] sm:$0xff] }
 0x330   :  { %1111 = vmatpush.msra.mxu3 %v1902_v4  ;;  %v68_v4 = vld [vmem:[%s2422_s18 + $0x40] sm:$0xff] }
 0x332   :  { %1112 = vmatpush.msra.mxu3 %v1910_v5 }
 0x333   :  { %1556 = vmatmul.msk.f32.gmra.mxu3 %vm87_vm0, %v77_v7 }
 0x335   :  { %1546 = vmatmul.msk.f32.gmra.mxu0 %vm87_vm0, %v67_v1 }
 0x33d   :  { %1547 = vmatmul.msk.f32.gmra.mxu0 %vm87_vm0, %v68_v4 }
 0x365   :  { %v493_v25 = vpop.permute.xlu2 %492 }
 0x366   :  { %v499_v29 = vmul.f32 %v493_v25, %v477_v27 }
 0x368   :  { %507 = vrot.lane.b32.xlu2 %v499_v29, %s1789_s27 }
 0x36d   :  { %v489_v37 = vpop.permute.xlu0 %488 }
 0x36e   :  { %v497_v42 = vmul.f32 %v489_v37, %v447_v41 }
 0x370   :  { %503 = vrot.lane.b32.xlu0 %v497_v42, %s1789_s27 }
 0x375   :  { %v491_v48 = vpop.permute.xlu1 %490 }
 0x376   :  { %v498_v50 = vmul.f32 %v491_v48, %v462_v49 }
 0x378   :  { %505 = vrot.lane.b32.xlu1 %v498_v50, %s1789_s27 }
 0x3aa   :  { %v177_v14 = vpop.f32.mrf.mxu0 }
 0x3ab   :  { %v178_v15 = vadd.f32 %v1936_v9, %v177_v14 }
 0x3ae   :  { %v2071_v11 = vpop.f32.mrf.mxu3 }
 0x3b2   :  { %v180_v18 = vpop.f32.mrf.mxu0 }
 0x3b3   :  { %v181_v20 = vadd.f32 %v1936_v9, %v180_v18 }
 0x3b6   :  { %v2073_v12 = vpop.f32.mrf.mxu3 }
 0x3c2   :  { %v508_v52 = vpop.permute.xlu2 %507 }
 0x3c3   :  { %v2018_v53 = vadd.f32 %v508_v52, %v484_v51 }
 0x3c5   :  { %1658 = vtanh.f32 %v2018_v53 }
 0x3cb   :  { %v1659_v54 = vpop.eup %1658 }
 0x3cc   :  { %525 = vrot.lane.b32.xlu2 %v1659_v54, %s1788_s26 }
 0x3e2   :  { %v504_v56 = vpop.permute.xlu0 %503 }
 0x3e3   :  { %v2023_v57 = vadd.f32 %v504_v56, %v482_v55 }
 0x3e5   :  { %1660 = vtanh.f32 %v2023_v57 }
 0x3ea   :  { %v506_v59 = vpop.permute.xlu1 %505 }
 0x3eb   :  { %v1661_v60 = vpop.eup %1660  ;;  %v2027_v17 = vadd.f32 %v506_v59, %v483_v58 }
 0x3ec   :  { %521 = vrot.lane.b32.xlu0 %v1661_v60, %s1788_s26 }
 0x3ed   :  { %1662 = vtanh.f32 %v2027_v17 }
 0x3f3   :  { %v1663_v61 = vpop.eup %1662 }
 0x3f4   :  { %523 = vrot.lane.b32.xlu1 %v1663_v61, %s1788_s26 }
 0x426   :  { %v526_v62 = vpop.permute.xlu2 %525 }
 0x427   :  { %v2032_v21 = vmul.f32 %v526_v62, %v477_v27  ;;  %v183_v27 = vpop.f32.mrf.mxu0 }
 0x428   :  { %v184_v29 = vadd.f32 %v1936_v9, %v183_v27 }
 0x429   :  { %561 = vrot.lane.b32.xlu2 %v2032_v21, %s1789_s27 }
 0x45e   :  { %v522_v63 = vpop.permute.xlu0 %521 }
 0x45f   :  { %v2036_v2 = vmul.f32 %v522_v63, %v447_v41 }
 0x461   :  { %557 = vrot.lane.b32.xlu0 %v2036_v2, %s1789_s27 }
 0x466   :  { %v524_v3 = vpop.permute.xlu1 %523 }
 0x467   :  { %v2045_v6 = vmul.f32 %v524_v3, %v462_v49 }
 0x469   :  { %559 = vrot.lane.b32.xlu1 %v2045_v6, %s1789_s27 }
 0x483   :  { %v562_v10 = vpop.permute.xlu2 %561 }
 0x4d3   :  { %v558_v5 = vpop.permute.xlu0 %557 }
 0x4d4   :  { %1566 = vmatmul.msk.f32.vlgmr.msrb.gmra.mxu3 %vm213_vm13, %v558_v5 }
 0x4db   :  { %v560_v8 = vpop.permute.xlu1 %559 }
 0x4dc   :  { %1567 = vmatmul.msk.f32.gmra.mxu3 %vm213_vm13, %v560_v8 }
 0x4e4   :  { %1568 = vmatmul.msk.f32.gmra.mxu3 %vm213_vm13, %v562_v10 }
 0x557   :  { %v586_v16 = vpop.f32.mrf.mxu3 }
 0x558   :  { %v595_v19 = vadd.f32 %v586_v16, %v178_v15 }
 0x55a   :  { %1664 = vtanh.f32 %v595_v19  ;;  %v1569_v35 = vmul.f32 -1.442695, %v595_v19 }
 0x55f   :  { %v589_v22 = vpop.f32.mrf.mxu3 }
 0x560   :  { %v1665_v23 = vpop.eup %1664  ;;  %v596_v25 = vadd.f32 %v589_v22, %v181_v20 }
 0x561   :  { %664 = vrot.lane.b32.xlu0 %v1665_v23, %s1788_s26 }
 0x562   :  { %1666 = vtanh.f32 %v596_v25  ;;  %v1570_v41 = vmul.f32 -1.442695, %v596_v25 }
 0x567   :  { %v592_v30 = vpop.f32.mrf.mxu3 }
 0x568   :  { %v1667_v31 = vpop.eup %1666  ;;  %v597_v32 = vadd.f32 %v592_v30, %v184_v29 }
 0x569   :  { %666 = vrot.lane.b32.xlu1 %v1667_v31, %s1788_s26 }
 0x56a   :  { %1668 = vtanh.f32 %v597_v32  ;;  %v1571_v34 = vmul.f32 -1.442695, %v597_v32 }
 0x56c   :  { %1670 = vpow2.f32 %v1571_v34 }
 0x56d   :  { %1672 = vpow2.f32 %v1569_v35 }
 0x570   :  { %v1669_v33 = vpop.eup %1668 }
 0x571   :  { %668 = vrot.lane.b32.xlu2 %v1669_v33, %s1788_s26 }
 0x572   :  { %v1671_v36 = vpop.eup %1670 }
 0x573   :  { %v609_v37 = vadd.f32 1.0, %v1671_v36  ;;  %v1673_v42 = vpop.eup %1672 }
 0x574   :  { %v607_v43 = vadd.f32 1.0, %v1673_v42 }
 0x575   :  { %1674 = vrcp.f32 %v609_v37  ;;  %v651_v56 = vand.u32 2147483648, %v609_v37  ;;  %vm645_vm12 = vweird.f32 %v609_v37  ;;  %v649_v58 = vand.u32 2147483647, %v609_v37 }
 0x576   :  { %1676 = vpow2.f32 %v1570_v41  ;;  %v621_v1 = vand.u32 2147483648, %v607_v43  ;;  %vm615_vm2 = vweird.f32 %v607_v43  ;;  %v619_v4 = vand.u32 2147483647, %v607_v43 }
 0x577   :  { %1678 = vrcp.f32 %v607_v43  ;;  %v652_v62 = vor.u32 1.1754944e-38, %v651_v56  ;;  %vm650_vm15 = vcmp.eq.f32.partialorder %v649_v58, 8.507059e+37 }
 0x578   :  { %v622_v10 = vor.u32 1.1754944e-38, %v621_v1  ;;  %vm620_vm4 = vcmp.eq.f32.partialorder %v619_v4, 8.507059e+37 }
 0x57b   :  { %v1675_v44 = vpop.eup %1674 }
 0x57c   :  { %v1677_v45 = vpop.eup %1676  ;;  %v641_v46 = vmul.f32 %v1675_v44, %v609_v37  ;;  %vm646_vm11 = vweird.f32 %v1675_v44 }
 0x57d   :  { %v608_v47 = vadd.f32 1.0, %v1677_v45  ;;  %v1679_v49 = vpop.eup %1678  ;;  %vm647_vm14 = vmor %vm645_vm12, %vm646_vm11 }
 0x57e   :  { %v642_v48 = vsub.f32 1.0, %v641_v46  ;;  %v611_v51 = vmul.f32 %v1679_v49, %v607_v43  ;;  %vm616_vm1 = vweird.f32 %v1679_v49 }
 0x57f   :  { %1680 = vrcp.f32 %v608_v47  ;;  %vm617_vm3 = vmor %vm615_vm2, %vm616_vm1  ;;  %v636_v19 = vand.u32 2147483648, %v608_v47  ;;  %vm630_vm6 = vweird.f32 %v608_v47  ;;  %v634_v20 = vand.u32 2147483647, %v608_v47 }
 0x580   :  { %v643_v50 = vmul.f32 %v1675_v44, %v642_v48  ;;  %v612_v54 = vsub.f32 1.0, %v611_v51 }
 0x581   :  { %v637_v23 = vor.u32 1.1754944e-38, %v636_v19  ;;  %vm635_vm8 = vcmp.eq.f32.partialorder %v634_v20, 8.507059e+37 }
 0x582   :  { %v644_v52 = vadd.f32 %v1675_v44, %v643_v50  ;;  %v613_v60 = vmul.f32 %v1679_v49, %v612_v54  ;;  %v71_v50 = vld [vmem:[%s2422_s18 + $0x58] sm:$0xff] }
 0x584   :  { %v648_v59 = vsel %vm647_vm14, %v1675_v44, %v644_v52  ;;  %v614_v7 = vadd.f32 %v1679_v49, %v613_v60 }
 0x585   :  { %v1681_v55 = vpop.eup %1680  ;;  %v653_v13 = vsel %vm650_vm15, %v652_v62, %v648_v59 }
 0x586   :  { %v626_v61 = vmul.f32 %v1681_v55, %v608_v47  ;;  %v618_v5 = vsel %vm617_vm3, %v1679_v49, %v614_v7  ;;  %vm631_vm5 = vweird.f32 %v1681_v55  ;;  %v660_v30 = vmul.f32 %v653_v13, %v2018_v53  ;;  %v70_v49 = vld [vmem:[%s2422_s18 + $0x50] sm:$0xff] }
 0x587   :  { %v623_v15 = vsel %vm620_vm4, %v622_v10, %v618_v5  ;;  %vm632_vm7 = vmor %vm630_vm6, %vm631_vm5 }
 0x588   :  { %v627_v0 = vsub.f32 1.0, %v626_v61  ;;  %v658_v34 = vmul.f32 %v623_v15, %v2023_v57 }
 0x58a   :  { %v628_v8 = vmul.f32 %v1681_v55, %v627_v0 }
 0x58c   :  { %v629_v18 = vadd.f32 %v1681_v55, %v628_v8 }
 0x58e   :  { %v633_v22 = vsel %vm632_vm7, %v1681_v55, %v629_v18 }
 0x58f   :  { %v638_v27 = vsel %vm635_vm8, %v637_v23, %v633_v22 }
 0x590   :  { %v659_v37 = vmul.f32 %v638_v27, %v2027_v17  ;;  %v69_v17 = vld [vmem:[%s2422_s18 + $0x48] sm:$0xff] }
 0x591   :  { %1548 = vmatmul.msk.f32.gmra.mxu0 %vm87_vm0, %v69_v17 }
 0x599   :  { %1549 = vmatmul.msk.f32.gmra.mxu0 %vm87_vm0, %v70_v49 }
 0x5a1   :  { %1550 = vmatmul.msk.f32.gmra.mxu0 %vm87_vm0, %v71_v50 }
 0x5cb   :  { %v669_v63 = vpop.permute.xlu2 %668 }
 0x5cc   :  { %v675_v3 = vmul.f32 %v669_v63, %v653_v13 }
 0x5ce   :  { %683 = vrot.lane.b32.xlu2 %v675_v3, %s1789_s27 }
 0x5d3   :  { %v665_v14 = vpop.permute.xlu0 %664 }
 0x5d4   :  { %v673_v16 = vmul.f32 %v665_v14, %v623_v15 }
 0x5d6   :  { %679 = vrot.lane.b32.xlu0 %v673_v16, %s1789_s27 }
 0x5db   :  { %v667_v25 = vpop.permute.xlu1 %666 }
 0x5dc   :  { %v674_v29 = vmul.f32 %v667_v25, %v638_v27 }
 0x5de   :  { %681 = vrot.lane.b32.xlu1 %v674_v29, %s1789_s27 }
 0x60e   :  { %v186_v55 = vpop.f32.mrf.mxu0 }
 0x60f   :  { %v187_v56 = vadd.f32 %v1936_v9, %v186_v55 }
 0x616   :  { %v189_v59 = vpop.f32.mrf.mxu0 }
 0x617   :  { %v190_v61 = vadd.f32 %v1936_v9, %v189_v59 }
 0x61e   :  { %v192_v3 = vpop.f32.mrf.mxu0 }
 0x61f   :  { %v193_v7 = vadd.f32 %v1936_v9, %v192_v3 }
 0x628   :  { %v684_v31 = vpop.permute.xlu2 %683 }
 0x629   :  { %v2085_v32 = vadd.f32 %v684_v31, %v660_v30 }
 0x62b   :  { %1682 = vtanh.f32 %v2085_v32 }
 0x631   :  { %v1683_v33 = vpop.eup %1682 }
 0x632   :  { %701 = vrot.lane.b32.xlu2 %v1683_v33, %s1788_s26 }
 0x648   :  { %v680_v35 = vpop.permute.xlu0 %679 }
 0x649   :  { %v2090_v36 = vadd.f32 %v680_v35, %v658_v34 }
 0x64b   :  { %1684 = vtanh.f32 %v2090_v36 }
 0x650   :  { %v682_v41 = vpop.permute.xlu1 %681 }
 0x651   :  { %v1685_v42 = vpop.eup %1684  ;;  %v2094_v53 = vadd.f32 %v682_v41, %v659_v37 }
 0x652   :  { %697 = vrot.lane.b32.xlu0 %v1685_v42, %s1788_s26 }
 0x653   :  { %1686 = vtanh.f32 %v2094_v53 }
 0x659   :  { %v1687_v43 = vpop.eup %1686 }
 0x65a   :  { %699 = vrot.lane.b32.xlu1 %v1687_v43, %s1788_s26 }
 0x68c   :  { %v702_v44 = vpop.permute.xlu2 %701 }
 0x68d   :  { %v2099_v57 = vmul.f32 %v702_v44, %v653_v13 }
 0x68f   :  { %737 = vrot.lane.b32.xlu2 %v2099_v57, %s1789_s27 }
 0x6c4   :  { %v698_v45 = vpop.permute.xlu0 %697 }
 0x6c5   :  { %v2103_v46 = vmul.f32 %v698_v45, %v623_v15 }
 0x6c7   :  { %733 = vrot.lane.b32.xlu0 %v2103_v46, %s1789_s27 }
 0x6cc   :  { %v700_v47 = vpop.permute.xlu1 %699 }
 0x6cd   :  { %v2111_v48 = vmul.f32 %v700_v47, %v638_v27 }
 0x6cf   :  { %735 = vrot.lane.b32.xlu1 %v2111_v48, %s1789_s27 }
 0x6e9   :  { %v738_v54 = vpop.permute.xlu2 %737 }
 0x739   :  { %v734_v51 = vpop.permute.xlu0 %733 }
 0x73a   :  { %1572 = vmatmul.msk.f32.vlgmr.msrb.gmra.mxu1 %vm213_vm13, %v734_v51 }
 0x741   :  { %v736_v52 = vpop.permute.xlu1 %735 }
 0x742   :  { %1573 = vmatmul.msk.f32.gmra.mxu1 %vm213_vm13, %v736_v52 }
 0x74a   :  { %1574 = vmatmul.msk.f32.gmra.mxu1 %vm213_vm13, %v738_v54 }
 0x7b7   :  { %v762_v58 = vpop.f32.mrf.mxu1 }
 0x7b8   :  { %v771_v60 = vadd.f32 %v762_v58, %v187_v56 }
 0x7ba   :  { %1688 = vtanh.f32 %v771_v60  ;;  %v1575_v10 = vmul.f32 -1.442695, %v771_v60 }
 0x7bf   :  { %v765_v62 = vpop.f32.mrf.mxu1 }
 0x7c0   :  { %v1689_v63 = vpop.eup %1688  ;;  %v772_v13 = vadd.f32 %v765_v62, %v190_v61 }
 0x7c1   :  { %840 = vrot.lane.b32.xlu0 %v1689_v63, %s1788_s26 }
 0x7c2   :  { %1690 = vtanh.f32 %v772_v13  ;;  %v1576_v16 = vmul.f32 -1.442695, %v772_v13 }
 0x7c7   :  { %v768_v0 = vpop.f32.mrf.mxu1 }
 0x7c8   :  { %v1691_v1 = vpop.eup %1690  ;;  %v773_v4 = vadd.f32 %v768_v0, %v193_v7 }
 0x7c9   :  { %842 = vrot.lane.b32.xlu1 %v1691_v1, %s1788_s26 }
 0x7ca   :  { %1692 = vtanh.f32 %v773_v4  ;;  %v1577_v8 = vmul.f32 -1.442695, %v773_v4 }
 0x7cc   :  { %1694 = vpow2.f32 %v1577_v8 }
 0x7cd   :  { %1696 = vpow2.f32 %v1575_v10 }
 0x7d0   :  { %v1693_v5 = vpop.eup %1692 }
 0x7d1   :  { %844 = vrot.lane.b32.xlu2 %v1693_v5, %s1788_s26 }
 0x7d2   :  { %v1695_v14 = vpop.eup %1694 }
 0x7d3   :  { %v785_v15 = vadd.f32 1.0, %v1695_v14  ;;  %v1697_v18 = vpop.eup %1696 }
 0x7d4   :  { %v783_v9 = vadd.f32 1.0, %v1697_v18 }
 0x7d5   :  { %1698 = vrcp.f32 %v785_v15  ;;  %v827_v35 = vand.u32 2147483648, %v785_v15  ;;  %vm821_vm10 = vweird.f32 %v785_v15  ;;  %v825_v37 = vand.u32 2147483647, %v785_v15 }
 0x7d6   :  { %1700 = vpow2.f32 %v1576_v16  ;;  %v797_v51 = vand.u32 2147483648, %v783_v9  ;;  %vm791_vm15 = vweird.f32 %v783_v9  ;;  %v795_v52 = vand.u32 2147483647, %v783_v9 }
 0x7d7   :  { %1702 = vrcp.f32 %v783_v9  ;;  %v828_v44 = vor.u32 1.1754944e-38, %v827_v35  ;;  %vm826_vm12 = vcmp.eq.f32.partialorder %v825_v37, 8.507059e+37  ;;  %v2172_v35 = vld [vmem:[%s2405_s5] ss:$0 sm:$0xff] }
 0x7d8   :  { %v798_v56 = vor.u32 1.1754944e-38, %v797_v51  ;;  %vm796_vm2 = vcmp.eq.f32.partialorder %v795_v52, 8.507059e+37 }
 0x7db   :  { %v1699_v19 = vpop.eup %1698 }
 0x7dc   :  { %v1701_v20 = vpop.eup %1700  ;;  %v817_v22 = vmul.f32 %v1699_v19, %v785_v15  ;;  %vm822_vm9 = vweird.f32 %v1699_v19 }
 0x7dd   :  { %v784_v23 = vadd.f32 1.0, %v1701_v20  ;;  %v1703_v27 = vpop.eup %1702  ;;  %vm823_vm11 = vmor %vm821_vm10, %vm822_vm9 }
 0x7de   :  { %v818_v25 = vsub.f32 1.0, %v817_v22  ;;  %v787_v30 = vmul.f32 %v1703_v27, %v783_v9  ;;  %vm792_vm14 = vweird.f32 %v1703_v27 }
 0x7df   :  { %1704 = vrcp.f32 %v784_v23  ;;  %vm793_vm1 = vmor %vm791_vm15, %vm792_vm14  ;;  %v812_v62 = vand.u32 2147483648, %v784_v23  ;;  %vm806_vm4 = vweird.f32 %v784_v23  ;;  %v810_v63 = vand.u32 2147483647, %v784_v23 }
 0x7e0   :  { %v819_v29 = vmul.f32 %v1699_v19, %v818_v25  ;;  %v788_v33 = vsub.f32 1.0, %v787_v30 }
 0x7e1   :  { %v813_v3 = vor.u32 1.1754944e-38, %v812_v62  ;;  %vm811_vm6 = vcmp.eq.f32.partialorder %v810_v63, 8.507059e+37 }
 0x7e2   :  { %v820_v31 = vadd.f32 %v1699_v19, %v819_v29  ;;  %v789_v42 = vmul.f32 %v1703_v27, %v788_v33  ;;  %v72_v29 = vld [vmem:[%s2422_s18 + $0x60] sm:$0xff] }
 0x7e3   :  { %1551 = vmatmul.msk.f32.gmra.mxu0 %vm87_vm0, %v72_v29 }
 0x7e4   :  { %v824_v41 = vsel %vm823_vm11, %v1699_v19, %v820_v31  ;;  %v790_v49 = vadd.f32 %v1703_v27, %v789_v42 }
 0x7e5   :  { %v1705_v34 = vpop.eup %1704  ;;  %v829_v17 = vsel %vm826_vm12, %v828_v44, %v824_v41 }
 0x7e6   :  { %v802_v43 = vmul.f32 %v1705_v34, %v784_v23  ;;  %v794_v54 = vsel %vm793_vm1, %v1703_v27, %v790_v49  ;;  %vm807_vm3 = vweird.f32 %v1705_v34  ;;  %v836_v4 = vmul.f32 %v829_v17, %v2085_v32 }
 0x7e7   :  { %v799_v59 = vsel %vm796_vm2, %v798_v56, %v794_v54  ;;  %vm808_vm5 = vmor %vm806_vm4, %vm807_vm3 }
 0x7e8   :  { %v803_v50 = vsub.f32 1.0, %v802_v43  ;;  %v834_v14 = vmul.f32 %v799_v59, %v2090_v36  ;;  %v199_v43 = vadd.f32 %v2172_v35, %v2002_v38 }
 0x7ea   :  { %v804_v55 = vmul.f32 %v1705_v34, %v803_v50 }
 0x7ec   :  { %v805_v61 = vadd.f32 %v1705_v34, %v804_v55 }
 0x7ee   :  { %v809_v13 = vsel %vm808_vm5, %v1705_v34, %v805_v61 }
 0x7ef   :  { %v814_v0 = vsel %vm811_vm6, %v813_v3, %v809_v13 }
 0x7f0   :  { %v835_v18 = vmul.f32 %v814_v0, %v2094_v53 }
 0x82b   :  { %v845_v45 = vpop.permute.xlu2 %844 }
 0x82c   :  { %v851_v47 = vmul.f32 %v845_v45, %v829_v17 }
 0x82e   :  { %859 = vrot.lane.b32.xlu2 %v851_v47, %s1789_s27  ;;  %v202_v47 = vadd.f32 %v2172_v35, %v2004_v39 }
 0x833   :  { %v841_v58 = vpop.permute.xlu0 %840 }
 0x834   :  { %v849_v60 = vmul.f32 %v841_v58, %v799_v59 }
 0x836   :  { %855 = vrot.lane.b32.xlu0 %v849_v60, %s1789_s27 }
 0x83b   :  { %v843_v7 = vpop.permute.xlu1 %842 }
 0x83c   :  { %v850_v1 = vmul.f32 %v843_v7, %v814_v0 }
 0x83e   :  { %857 = vrot.lane.b32.xlu1 %v850_v1, %s1789_s27 }
 0x860   :  { %v195_v34 = vpop.f32.mrf.mxu0 }
 0x861   :  { %v196_v37 = vadd.f32 %v2172_v35, %v195_v34 }
 0x888   :  { %v860_v5 = vpop.permute.xlu2 %859 }
 0x889   :  { %v2136_v8 = vadd.f32 %v860_v5, %v836_v4 }
 0x88b   :  { %1706 = vtanh.f32 %v2136_v8 }
 0x891   :  { %v1707_v10 = vpop.eup %1706 }
 0x892   :  { %877 = vrot.lane.b32.xlu2 %v1707_v10, %s1788_s26 }
 0x8a8   :  { %v856_v15 = vpop.permute.xlu0 %855 }
 0x8a9   :  { %v2141_v16 = vadd.f32 %v856_v15, %v834_v14 }
 0x8ab   :  { %1708 = vtanh.f32 %v2141_v16 }
 0x8b0   :  { %v858_v9 = vpop.permute.xlu1 %857 }
 0x8b1   :  { %v1709_v19 = vpop.eup %1708  ;;  %v2145_v32 = vadd.f32 %v858_v9, %v835_v18 }
 0x8b2   :  { %873 = vrot.lane.b32.xlu0 %v1709_v19, %s1788_s26 }
 0x8b3   :  { %1710 = vtanh.f32 %v2145_v32 }
 0x8b9   :  { %v1711_v20 = vpop.eup %1710 }
 0x8ba   :  { %875 = vrot.lane.b32.xlu1 %v1711_v20, %s1788_s26 }
 0x8ec   :  { %v878_v22 = vpop.permute.xlu2 %877 }
 0x8ed   :  { %v2150_v36 = vmul.f32 %v878_v22, %v829_v17 }
 0x8ef   :  { %913 = vrot.lane.b32.xlu2 %v2150_v36, %s1789_s27 }
 0x924   :  { %v874_v23 = vpop.permute.xlu0 %873 }
 0x925   :  { %v2154_v25 = vmul.f32 %v874_v23, %v799_v59 }
 0x927   :  { %909 = vrot.lane.b32.xlu0 %v2154_v25, %s1789_s27 }
 0x92c   :  { %v876_v53 = vpop.permute.xlu1 %875 }
 0x92d   :  { %v2158_v27 = vmul.f32 %v876_v53, %v814_v0 }
 0x92f   :  { %911 = vrot.lane.b32.xlu1 %v2158_v27, %s1789_s27 }
 0x949   :  { %v914_v33 = vpop.permute.xlu2 %913 }
 0x999   :  { %v910_v30 = vpop.permute.xlu0 %909 }
 0x99a   :  { %1578 = vmatmul.msk.f32.vlgmr.msra.gmra.mxu2 %vm213_vm13, %v910_v30 }
 0x9a1   :  { %v912_v31 = vpop.permute.xlu1 %911 }
 0x9a2   :  { %1579 = vmatmul.msk.f32.gmra.mxu2 %vm213_vm13, %v912_v31 }
 0x9aa   :  { %1580 = vmatmul.msk.f32.gmra.mxu2 %vm213_vm13, %v914_v33 }
 0xa1d   :  { %v938_v41 = vpop.f32.mrf.mxu2 }
 0xa1e   :  { %v947_v42 = vadd.f32 %v938_v41, %v196_v37 }
 0xa20   :  { %1712 = vtanh.f32 %v947_v42  ;;  %v1581_v38 = vmul.f32 -1.442695, %v947_v42 }
 0xa25   :  { %v941_v44 = vpop.f32.mrf.mxu2 }
 0xa26   :  { %v1713_v45 = vpop.eup %1712  ;;  %v948_v17 = vadd.f32 %v941_v44, %v199_v43 }
 0xa27   :  { %1016 = vrot.lane.b32.xlu0 %v1713_v45, %s1788_s26 }
 0xa28   :  { %1714 = vtanh.f32 %v948_v17  ;;  %v1582_v58 = vmul.f32 -1.442695, %v948_v17 }
 0xa2d   :  { %v944_v49 = vpop.f32.mrf.mxu2 }
 0xa2e   :  { %v1715_v50 = vpop.eup %1714  ;;  %v949_v51 = vadd.f32 %v944_v49, %v202_v47 }
 0xa2f   :  { %1018 = vrot.lane.b32.xlu1 %v1715_v50, %s1788_s26 }
 0xa30   :  { %1716 = vtanh.f32 %v949_v51  ;;  %v1583_v54 = vmul.f32 -1.442695, %v949_v51 }
 0xa32   :  { %1718 = vpow2.f32 %v1583_v54 }
 0xa33   :  { %1720 = vpow2.f32 %v1581_v38 }
 0xa36   :  { %v1717_v52 = vpop.eup %1716 }
 0xa37   :  { %1020 = vrot.lane.b32.xlu2 %v1717_v52, %s1788_s26 }
 0xa38   :  { %v1719_v55 = vpop.eup %1718 }
 0xa39   :  { %v961_v56 = vadd.f32 1.0, %v1719_v55  ;;  %v1721_v59 = vpop.eup %1720 }
 0xa3a   :  { %v959_v39 = vadd.f32 1.0, %v1721_v59 }
 0xa3b   :  { %1722 = vrcp.f32 %v961_v56  ;;  %v1003_v10 = vand.u32 2147483648, %v961_v56  ;;  %vm997_vm7 = vweird.f32 %v961_v56  ;;  %v1001_v14 = vand.u32 2147483647, %v961_v56 }
 0xa3c   :  { %1724 = vpow2.f32 %v1582_v58  ;;  %v973_v30 = vand.u32 2147483648, %v959_v39  ;;  %vm967_vm11 = vweird.f32 %v959_v39  ;;  %v971_v31 = vand.u32 2147483647, %v959_v39 }
 0xa3d   :  { %1726 = vrcp.f32 %v959_v39  ;;  %v1004_v19 = vor.u32 1.1754944e-38, %v1003_v10  ;;  %vm1002_vm9 = vcmp.eq.f32.partialorder %v1001_v14, 8.507059e+37  ;;  %v205_v10 = vadd.f32 %v2172_v35, %v2006_v40 }
 0xa3e   :  { %v974_v37 = vor.u32 1.1754944e-38, %v973_v30  ;;  %vm972_vm14 = vcmp.eq.f32.partialorder %v971_v31, 8.507059e+37  ;;  %v1790_v14 = vmov 0   ;;  %v211_v40 = vadd.f32 %v2172_v35, %v2073_v12 }
 0xa3f   :  { %1612 = vset.pattern.permute.xlu2 %v1790_v14  ;;  %1610 = vset.pattern.permute.xlu0 %v1790_v14 }
 0xa40   :  { %1611 = vset.pattern.permute.xlu1 %v1790_v14 }
 0xa41   :  { %v1723_v60 = vpop.eup %1722 }
 0xa42   :  { %v1725_v61 = vpop.eup %1724  ;;  %v993_v62 = vmul.f32 %v1723_v60, %v961_v56  ;;  %vm998_vm0 = vweird.f32 %v1723_v60 }
 0xa43   :  { %v960_v63 = vadd.f32 1.0, %v1725_v61  ;;  %v1727_v3 = vpop.eup %1726  ;;  %vm999_vm8 = vmor %vm997_vm7, %vm998_vm0 }
 0xa44   :  { %v994_v13 = vsub.f32 1.0, %v993_v62  ;;  %v963_v0 = vmul.f32 %v1727_v3, %v959_v39  ;;  %vm968_vm10 = vweird.f32 %v1727_v3 }
 0xa45   :  { %1728 = vrcp.f32 %v960_v63  ;;  %vm969_vm12 = vmor %vm967_vm11, %vm968_vm10  ;;  %v988_v45 = vand.u32 2147483648, %v960_v63  ;;  %vm982_vm1 = vweird.f32 %v960_v63  ;;  %v986_v17 = vand.u32 2147483647, %v960_v63 }
 0xa46   :  { %v995_v7 = vmul.f32 %v1723_v60, %v994_v13  ;;  %v964_v4 = vsub.f32 1.0, %v963_v0 }
 0xa47   :  { %v989_v49 = vor.u32 1.1754944e-38, %v988_v45  ;;  %vm987_vm3 = vcmp.eq.f32.partialorder %v986_v17, 8.507059e+37 }
 0xa48   :  { %v996_v1 = vadd.f32 %v1723_v60, %v995_v7  ;;  %v965_v18 = vmul.f32 %v1727_v3, %v964_v4 }
 0xa4a   :  { %v1000_v15 = vsel %vm999_vm8, %v1723_v60, %v996_v1  ;;  %v966_v53 = vadd.f32 %v1727_v3, %v965_v18 }
 0xa4b   :  { %v1729_v5 = vpop.eup %1728  ;;  %v1005_v22 = vsel %vm1002_vm9, %v1004_v19, %v1000_v15 }
 0xa4c   :  { %v978_v9 = vmul.f32 %v1729_v5, %v960_v63  ;;  %v970_v33 = vsel %vm969_vm12, %v1727_v3, %v966_v53  ;;  %vm983_vm15 = vweird.f32 %v1729_v5  ;;  %v1012_v54 = vmul.f32 %v1005_v22, %v2136_v8 }
 0xa4d   :  { %v975_v42 = vsel %vm972_vm14, %v974_v37, %v970_v33  ;;  %vm984_vm2 = vmor %vm982_vm1, %vm983_vm15 }
 0xa4e   :  { %v979_v29 = vsub.f32 1.0, %v978_v9  ;;  %v1010_v58 = vmul.f32 %v975_v42, %v2141_v16  ;;  %v208_v9 = vadd.f32 %v2172_v35, %v2071_v11  ;;  %v2229_v11 = vld [vmem:[%s2402_s2] sm:$0xff] }
 0xa4f   :  { %vm709_vm4 = vcmp.gt.s32.totalorder %v2229_v11, 2  ;;  %vm1061_vm11 = vcmp.gt.s32.totalorder %v2229_v11, 4 }
 0xa50   :  { %v980_v34 = vmul.f32 %v1729_v5, %v979_v29  ;;  %v712_v31 = vsel %vm709_vm4, 1, %v1790_v14 }
 0xa52   :  { %v981_v44 = vadd.f32 %v1729_v5, %v980_v34 }
 0xa54   :  { %v985_v47 = vsel %vm984_vm2, %v1729_v5, %v981_v44 }
 0xa55   :  { %v990_v51 = vsel %vm987_vm3, %v989_v49, %v985_v47  ;;  %vm357_vm3 = vcmp.gt.s32.totalorder %v2229_v11, 0 }
 0xa56   :  { %v1011_v60 = vmul.f32 %v990_v51, %v2145_v32 }
 0xa91   :  { %v1021_v20 = vpop.permute.xlu2 %1020 }
 0xa92   :  { %v1027_v23 = vmul.f32 %v1021_v20, %v1005_v22 }
 0xa94   :  { %1035 = vrot.lane.b32.xlu2 %v1027_v23, %s1789_s27 }
 0xa99   :  { %v1017_v41 = vpop.permute.xlu0 %1016 }
 0xa9a   :  { %v1025_v43 = vmul.f32 %v1017_v41, %v975_v42 }
 0xa9c   :  { %1031 = vrot.lane.b32.xlu0 %v1025_v43, %s1789_s27 }
 0xaa1   :  { %v1019_v50 = vpop.permute.xlu1 %1018 }
 0xaa2   :  { %v1026_v52 = vmul.f32 %v1019_v50, %v990_v51 }
 0xaa4   :  { %1033 = vrot.lane.b32.xlu1 %v1026_v52, %s1789_s27 }
 0xaee   :  { %v1036_v38 = vpop.permute.xlu2 %1035 }
 0xaef   :  { %v2186_v55 = vadd.f32 %v1036_v38, %v1012_v54 }
 0xaf1   :  { %1730 = vtanh.f32 %v2186_v55 }
 0xaf7   :  { %v1731_v56 = vpop.eup %1730 }
 0xaf8   :  { %1053 = vrot.lane.b32.xlu2 %v1731_v56, %s1788_s26 }
 0xb0e   :  { %v1032_v59 = vpop.permute.xlu0 %1031 }
 0xb0f   :  { %v2191_v39 = vadd.f32 %v1032_v59, %v1010_v58 }
 0xb11   :  { %1732 = vtanh.f32 %v2191_v39 }
 0xb16   :  { %v1034_v61 = vpop.permute.xlu1 %1033 }
 0xb17   :  { %v1733_v62 = vpop.eup %1732  ;;  %v2195_v8 = vadd.f32 %v1034_v61, %v1011_v60 }
 0xb18   :  { %1049 = vrot.lane.b32.xlu0 %v1733_v62, %s1788_s26 }
 0xb19   :  { %1734 = vtanh.f32 %v2195_v8 }
 0xb1f   :  { %v1735_v63 = vpop.eup %1734 }
 0xb20   :  { %1051 = vrot.lane.b32.xlu1 %v1735_v63, %s1788_s26 }
 0xb52   :  { %v1054_v13 = vpop.permute.xlu2 %1053 }
 0xb53   :  { %v2200_v16 = vmul.f32 %v1054_v13, %v1005_v22 }
 0xb55   :  { %1089 = vrot.lane.b32.xlu2 %v2200_v16, %s1789_s27 }
 0xb8a   :  { %v1050_v3 = vpop.permute.xlu0 %1049 }
 0xb8b   :  { %v2204_v7 = vmul.f32 %v1050_v3, %v975_v42 }
 0xb8d   :  { %1085 = vrot.lane.b32.xlu0 %v2204_v7, %s1789_s27 }
 0xb92   :  { %v1052_v32 = vpop.permute.xlu1 %1051 }
 0xb93   :  { %v2208_v0 = vmul.f32 %v1052_v32, %v990_v51 }
 0xb95   :  { %1087 = vrot.lane.b32.xlu1 %v2208_v0, %s1789_s27 }
 0xbaf   :  { %v1090_v5 = vpop.permute.xlu2 %1089 }
 0xbff   :  { %v1086_v1 = vpop.permute.xlu0 %1085 }
 0xc00   :  { %1584 = vmatmul.msk.f32.vlgmr.msra.gmra.mxu3 %vm213_vm13, %v1086_v1 }
 0xc07   :  { %v1088_v4 = vpop.permute.xlu1 %1087 }
 0xc08   :  { %1585 = vmatmul.msk.f32.gmra.mxu3 %vm213_vm13, %v1088_v4 }
 0xc10   :  { %1586 = vmatmul.msk.f32.gmra.mxu3 %vm213_vm13, %v1090_v5 }
 0xc83   :  { %v1114_v15 = vpop.f32.mrf.mxu3 }
 0xc84   :  { %v1123_v18 = vadd.f32 %v1114_v15, %v205_v10 }
 0xc86   :  { %1736 = vtanh.f32 %v1123_v18  ;;  %v1587_v35 = vmul.f32 -1.442695, %v1123_v18 }
 0xc8b   :  { %v1117_v19 = vpop.f32.mrf.mxu3 }
 0xc8c   :  { %v1737_v20 = vpop.eup %1736  ;;  %v1124_v22 = vadd.f32 %v1117_v19, %v208_v9 }
 0xc8d   :  { %1192 = vrot.lane.b32.xlu0 %v1737_v20, %s1788_s26  ;;  %v1064_v20 = vsel %vm1061_vm11, 1, %v1790_v14 }
 0xc8e   :  { %1738 = vtanh.f32 %v1124_v22  ;;  %v1588_v37 = vmul.f32 -1.442695, %v1124_v22 }
 0xc93   :  { %v1120_v23 = vpop.f32.mrf.mxu3 }
 0xc94   :  { %v1739_v53 = vpop.eup %1738  ;;  %v1125_v29 = vadd.f32 %v1120_v23, %v211_v40 }
 0xc95   :  { %1194 = vrot.lane.b32.xlu1 %v1739_v53, %s1788_s26  ;;  %v58_v53 = vld [vmem:[%s2402_s2 + $0x8] sm:$0xff] }
 0xc96   :  { %1740 = vtanh.f32 %v1125_v29  ;;  %v1589_v12 = vmul.f32 -1.442695, %v1125_v29  ;;  %vm358_vm2 = vcmp.gt.s32.totalorder %v58_v53, 0 }
 0xc98   :  { %1742 = vpow2.f32 %v1589_v12 }
 0xc99   :  { %1744 = vpow2.f32 %v1587_v35 }
 0xc9c   :  { %v1741_v30 = vpop.eup %1740 }
 0xc9d   :  { %1196 = vrot.lane.b32.xlu2 %v1741_v30, %s1788_s26 }
 0xc9e   :  { %v1743_v33 = vpop.eup %1742 }
 0xc9f   :  { %v1137_v34 = vadd.f32 1.0, %v1743_v33  ;;  %v1745_v41 = vpop.eup %1744  ;;  %v361_v33 = vsel %vm358_vm2, 1, %v1790_v14 }
 0xca0   :  { %v1135_v42 = vadd.f32 1.0, %v1745_v41 }
 0xca1   :  { %1746 = vrcp.f32 %v1137_v34  ;;  %v1179_v56 = vand.u32 2147483648, %v1137_v34  ;;  %vm1173_vm6 = vweird.f32 %v1137_v34  ;;  %v1177_v58 = vand.u32 2147483647, %v1137_v34 }
 0xca2   :  { %1748 = vpow2.f32 %v1588_v37  ;;  %v1149_v4 = vand.u32 2147483648, %v1135_v42  ;;  %vm1143_vm9 = vweird.f32 %v1135_v42  ;;  %v1147_v5 = vand.u32 2147483647, %v1135_v42 }
 0xca3   :  { %1750 = vrcp.f32 %v1135_v42  ;;  %v1180_v62 = vor.u32 1.1754944e-38, %v1179_v56  ;;  %vm1178_vm7 = vcmp.eq.f32.partialorder %v1177_v58, 8.507059e+37  ;;  %v360_v37 = vsel %vm357_vm3, 1, %v1790_v14 }
 0xca4   :  { %v1150_v18 = vor.u32 1.1754944e-38, %v1149_v4  ;;  %vm1148_vm12 = vcmp.eq.f32.partialorder %v1147_v5, 8.507059e+37  ;;  %v1261_v5 = vld [vmem:[%s2410_s10 + $0x8] sm:$0xff] }
 0xca5   :  { %716 = vperm.xlu2 %1612, %v712_v31   ;;  %1283 = vmatpush.msra.mxu1 %v1261_v5 }
 0xca7   :  { %v1747_v43 = vpop.eup %1746 }
 0xca8   :  { %v1749_v44 = vpop.eup %1748  ;;  %v1169_v45 = vmul.f32 %v1747_v43, %v1137_v34  ;;  %vm1174_vm5 = vweird.f32 %v1747_v43 }
 0xca9   :  { %v1136_v17 = vadd.f32 1.0, %v1749_v44  ;;  %v1751_v49 = vpop.eup %1750  ;;  %vm1175_vm0 = vmor %vm1173_vm6, %vm1174_vm5  ;;  %vm533_vm5 = vcmp.gt.s32.totalorder %v2229_v11, 1  ;;  %vm886_vm6 = vcmp.gt.s32.totalorder %v58_v53, 3 }
 0xcaa   :  { %v1170_v47 = vsub.f32 1.0, %v1169_v45  ;;  %v1139_v51 = vmul.f32 %v1751_v49, %v1135_v42  ;;  %vm1144_vm8 = vweird.f32 %v1751_v49  ;;  %v536_v41 = vsel %vm533_vm5, 1, %v1790_v14 }
 0xcab   :  { %1752 = vrcp.f32 %v1136_v17  ;;  %vm1145_vm10 = vmor %vm1143_vm9, %vm1144_vm8  ;;  %v1164_v23 = vand.u32 2147483648, %v1136_v17  ;;  %vm1158_vm15 = vweird.f32 %v1136_v17  ;;  %v1162_v29 = vand.u32 2147483647, %v1136_v17 }
 0xcac   :  { %v1171_v50 = vmul.f32 %v1747_v43, %v1170_v47  ;;  %v1140_v54 = vsub.f32 1.0, %v1139_v51  ;;  %v889_v42 = vsel %vm886_vm6, 1, %v1790_v14  ;;  %vm1238_vm8 = vcmp.gt.s32.totalorder %v58_v53, 5  ;;  %v59_v47 = vld [vmem:[%s2402_s2 + $0x10] sm:$0xff]  ;;  %s1791_s2 = smov [#allocation2]  }
 0xcad   :  { %v1165_v31 = vor.u32 1.1754944e-38, %v1164_v23  ;;  %vm1163_vm4 = vcmp.eq.f32.partialorder %v1162_v29, 8.507059e+37  ;;  %vm1062_vm9 = vcmp.gt.s32.totalorder %v58_v53, 4  ;;  %v1241_v45 = vsel %vm1238_vm8, 1, %v1790_v14  ;;  %s1528_s21 = sshll.u32 %s1791_s2, 4  ;;  %s1529_s21 = int_to_ptr.vmem [resolvable:$true] %s1528_s21 }
 0xcae   :  { %v1172_v52 = vadd.f32 %v1747_v43, %v1171_v50  ;;  %v1141_v60 = vmul.f32 %v1751_v49, %v1140_v54  ;;  %vm711_vm11 = vcmp.gt.s32.totalorder %v59_v47, 2  ;;  %vm887_vm2 = vcmp.gt.s32.totalorder %v59_v47, 3 }
 0xcaf   :  { %v714_v50 = vsel %vm711_vm11, 1, %v1790_v14  ;;  %v890_v4 = vsel %vm887_vm2, 1, %v1790_v14  ;;  %vm1239_vm3 = vcmp.gt.s32.totalorder %v59_v47, 5 }
 0xcb0   :  { %v1176_v59 = vsel %vm1175_vm0, %v1747_v43, %v1172_v52  ;;  %v1142_v32 = vadd.f32 %v1751_v49, %v1141_v60  ;;  %vm534_vm0 = vcmp.gt.s32.totalorder %v58_v53, 1 }
 0xcb1   :  { %v1753_v38 = vpop.eup %1752  ;;  %v2234_v13 = vsel %vm1178_vm7, %v1180_v62, %v1176_v59  ;;  %v537_v43 = vsel %vm534_vm0, 1, %v1790_v14  ;;  %vm885_vm7 = vcmp.gt.s32.totalorder %v2229_v11, 3 }
 0xcb2   :  { %v1154_v61 = vmul.f32 %v1753_v38, %v1136_v17  ;;  %v1146_v10 = vsel %vm1145_vm10, %v1751_v49, %v1142_v32  ;;  %vm1159_vm14 = vweird.f32 %v1753_v38  ;;  %v888_v44 = vsel %vm885_vm7, 1, %v1790_v14 }
 0xcb3   :  { %v2239_v19 = vsel %vm1148_vm12, %v1150_v18, %v1146_v10  ;;  %vm1160_vm1 = vmor %vm1158_vm15, %vm1159_vm14  ;;  %v1065_v17 = vsel %vm1062_vm9, 1, %v1790_v14  ;;  %vm1237_vm10 = vcmp.gt.s32.totalorder %v2229_v11, 5  ;;  %vm710_vm12 = vcmp.gt.s32.totalorder %v58_v53, 2  ;;  %v1260_v10 = vld [vmem:[%s2410_s10] sm:$0xff] }
 0xcb4   :  { %v1155_v1 = vsub.f32 1.0, %v1154_v61  ;;  %v1240_v49 = vsel %vm1237_vm10, 1, %v1790_v14  ;;  %v713_v51 = vsel %vm710_vm12, 1, %v1790_v14  ;;  %vm535_vm14 = vcmp.gt.s32.totalorder %v59_v47, 1  ;;  %1284 = vmatpush.msra.mxu1 %v1260_v10 }
 0xcb5   :  { %v538_v52 = vsel %vm535_vm14, 1, %v1790_v14  ;;  %v1186_v59 = vmul.f32 %v2239_v19, %v2191_v39  ;;  %vm359_vm15 = vcmp.gt.s32.totalorder %v59_v47, 0 }
 0xcb6   :  { %v1156_v15 = vmul.f32 %v1753_v38, %v1155_v1 }
 0xcb8   :  { %v1157_v40 = vadd.f32 %v1753_v38, %v1156_v15  ;;  %v2292_v15 = vld [vmem:[%s2423_s24] sm:$0xff] }
 0xcba   :  { %v1161_v30 = vsel %vm1160_vm1, %v1753_v38, %v1157_v40  ;;  %v1188_v38 = vmul.f32 %v2234_v13, %v2186_v55  ;;  %v362_v55 = vsel %vm359_vm15, 1, %v1790_v14  ;;  %vm1063_vm1 = vcmp.gt.s32.totalorder %v59_v47, 4 }
 0xcbb   :  { %v2248_v35 = vsel %vm1163_vm4, %v1165_v31, %v1161_v30  ;;  %v1066_v39 = vsel %vm1063_vm1, 1, %v1790_v14  ;;  %vm1262_vm4 = vcmask 130048  }
 0xcbc   :  { %v1187_v62 = vmul.f32 %v2248_v35, %v2195_v8  ;;  %v1242_v8 = vsel %vm1239_vm3, 1, %v1790_v14  ;;  %1590 = vmatmul.msk.f32.vlgmr.msra.gmra.mxu1 %vm1262_vm4, %v2292_v15  ;;  %v2299_v14 = vld [vmem:[%s2423_s24 + $0x8] sm:$0xff] }
 0xcc4   :  { %1591 = vmatmul.msk.f32.gmra.mxu1 %vm1262_vm4, %v2299_v14 }
 0xcf7   :  { %v1197_v63 = vpop.permute.xlu2 %1196 }
 0xcf8   :  { %v1203_v3 = vmul.f32 %v1197_v63, %v2234_v13 }
 0xcfa   :  { %1211 = vrot.lane.b32.xlu2 %v1203_v3, %s1789_s27 }
 0xcff   :  { %v1193_v9 = vpop.permute.xlu0 %1192  ;;  %v717_v54 = vpop.permute.xlu2 %716 }
 0xd00   :  { %v1201_v22 = vmul.f32 %v1193_v9, %v2239_v19  ;;  %vm724_vm0 = vcmp.eq.s32.totalorder %v717_v54, 1 }
 0xd02   :  { %1207 = vrot.lane.b32.xlu0 %v1201_v22, %s1789_s27  ;;  %1068 = vperm.xlu2 %1612, %v1064_v20  }
 0xd07   :  { %v1195_v12 = vpop.permute.xlu1 %1194 }
 0xd08   :  { %v1202_v34 = vmul.f32 %v1195_v12, %v2248_v35 }
 0xd0a   :  { %1209 = vrot.lane.b32.xlu1 %v1202_v34, %s1789_s27  ;;  %367 = vperm.xlu2 %1612, %v361_v33  }
 0xd0b   :  { %364 = vperm.xlu0 %1610, %v360_v37  }
 0xd12   :  { %540 = vperm.xlu1 %1611, %v536_v41   ;;  %895 = vperm.xlu2 %1612, %v889_v42  }
 0xd13   :  { %543 = vperm.xlu0 %1610, %v537_v43  }
 0xd1a   :  { %892 = vperm.xlu1 %1611, %v888_v44   ;;  %1247 = vperm.xlu2 %1612, %v1241_v45  }
 0xd1b   :  { %1071 = vperm.xlu0 %1610, %v1065_v17  }
 0xd22   :  { %1244 = vperm.xlu1 %1611, %v1240_v49   ;;  %722 = vperm.xlu2 %1612, %v714_v50  }
 0xd2a   :  { %719 = vperm.xlu1 %1611, %v713_v51  }
 0xd32   :  { %546 = vperm.xlu1 %1611, %v538_v52  }
 0xd54   :  { %v1212_v11 = vpop.permute.xlu2 %1211 }
 0xd55   :  { %v1218_v56 = vadd.f32 %v1212_v11, %v1188_v38 }
 0xd57   :  { %1754 = vtanh.f32 %v1218_v56 }
 0xd5c   :  { %v1069_v22 = vpop.permute.xlu2 %1068 }
 0xd5d   :  { %v1755_v58 = vpop.eup %1754  ;;  %vm1076_vm8 = vcmp.eq.s32.totalorder %v1069_v22, 1 }
 0xd5e   :  { %1229 = vrot.lane.b32.xlu2 %v1755_v58, %s1788_s26  ;;  %v1286_v58 = vpop.f32.mrf.mxu1 }
 0xd64   :  { %v368_v53 = vpop.permute.xlu2 %367 }
 0xd65   :  { %vm373_vm9 = vcmp.eq.s32.totalorder %v368_v53, 1 }
 0xd66   :  { %v376_v44 = vsel %vm373_vm9, %v1963_v26, 0.0  ;;  %v1460_v26 = vld [vmem:[%s2409_s9] sm:$0xff] }
 0xd6c   :  { %v896_v31 = vpop.permute.xlu2 %895 }
 0xd6d   :  { %vm901_vm14 = vcmp.eq.s32.totalorder %v896_v31, 1  ;;  %v1385_v31 = vld [vmem:[%s2408_s8] sm:$0xff] }
 0xd74   :  { %v1208_v60 = vpop.permute.xlu0 %1207  ;;  %v1248_v45 = vpop.permute.xlu2 %1247 }
 0xd75   :  { %v1216_v61 = vadd.f32 %v1208_v60, %v1186_v59  ;;  %vm1253_vm1 = vcmp.eq.s32.totalorder %v1248_v45, 1  ;;  %v1292_v59 = vld [vmem:[%s2406_s6] sm:$0xff]  ;;  %v1293_v60 = vld [vmem:[%s2406_s6 + $0x8] sm:$0xff] }
 0xd77   :  { %1756 = vtanh.f32 %v1216_v61  ;;  %v1294_v61 = vld [vmem:[%s2406_s6 + $0x10] sm:$0xff] }
 0xd7c   :  { %v1210_v63 = vpop.permute.xlu1 %1209 }
 0xd7d   :  { %v1757_v3 = vpop.eup %1756  ;;  %v1217_v32 = vadd.f32 %v1210_v63, %v1187_v62  ;;  %v365_v20 = vpop.permute.xlu0 %364 }
 0xd7e   :  { %1225 = vrot.lane.b32.xlu0 %v1757_v3, %s1788_s26  ;;  %vm372_vm5 = vcmp.eq.s32.totalorder %v365_v20, 1 }
 0xd7f   :  { %1758 = vtanh.f32 %v1217_v32  ;;  %v375_v12 = vsel %vm372_vm5, %v1967_v28, 0.0 }
 0xd84   :  { %v541_v18 = vpop.permute.xlu1 %540 }
 0xd85   :  { %v1759_v1 = vpop.eup %1758  ;;  %v544_v23 = vpop.permute.xlu0 %543  ;;  %vm548_vm6 = vcmp.eq.s32.totalorder %v541_v18, 1 }
 0xd86   :  { %1227 = vrot.lane.b32.xlu1 %v1759_v1, %s1788_s26  ;;  %370 = vperm.xlu0 %1610, %v362_v55   ;;  %v551_v33 = vsel %vm548_vm6, %v2036_v2, %v375_v12  ;;  %vm549_vm10 = vcmp.eq.s32.totalorder %v544_v23, 1  ;;  %v1435_v1 = vld [vmem:[%s2411_s11 + $0x8] sm:$0xff]  ;;  %v1410_v12 = vld [vmem:[%s2407_s7] sm:$0xff] }
 0xd87   :  { %v727_v34 = vsel %vm724_vm0, %v2103_v46, %v551_v33  ;;  %v552_v2 = vsel %vm549_vm10, %v2045_v6, %v376_v44  ;;  %v1468_v33 = vld [vmem:[%s2414_s14 + $0x8] sm:$0xff]  ;;  %v1469_v44 = vld [vmem:[%s2415_s15] sm:$0xff] }
 0xd8c   :  { %v893_v9 = vpop.permute.xlu1 %892 }
 0xd8d   :  { %v1072_v30 = vpop.permute.xlu0 %1071  ;;  %vm900_vm7 = vcmp.eq.s32.totalorder %v893_v9, 1  ;;  %v1614_v9 = vld [vmem:[%s2413_s13] ss:$0 sm:$0xff] }
 0xd8e   :  { %1074 = vperm.xlu1 %1611, %v1066_v39   ;;  %898 = vperm.xlu0 %1610, %v890_v4   ;;  %v903_v37 = vsel %vm900_vm7, %v2154_v25, %v727_v34  ;;  %vm1077_vm15 = vcmp.eq.s32.totalorder %v1072_v30, 1  ;;  %v1434_v34 = vld [vmem:[%s2411_s11] sm:$0xff] }
 0xd8f   :  { %v1079_v28 = vsel %vm1076_vm8, %v2204_v7, %v903_v37  ;;  %vm1386_vm8 = vcmask 195584  }
 0xd94   :  { %v1245_v40 = vpop.permute.xlu1 %1244 }
 0xd95   :  { %vm1252_vm12 = vcmp.eq.s32.totalorder %v1245_v40, 1 }
 0xd96   :  { %1250 = vperm.xlu0 %1610, %v1242_v8  }
 0xd9c   :  { %v720_v29 = vpop.permute.xlu1 %719 }
 0xd9d   :  { %vm725_vm11 = vcmp.eq.s32.totalorder %v720_v29, 1 }
 0xd9e   :  { %v728_v46 = vsel %vm725_vm11, %v2111_v48, %v552_v2  ;;  %v723_v48 = vpop.permute.xlu2 %722 }
 0xd9f   :  { %v904_v25 = vsel %vm901_vm14, %v2158_v27, %v728_v46  ;;  %vm726_vm6 = vcmp.eq.s32.totalorder %v723_v48, 1 }
 0xda0   :  { %v1080_v6 = vsel %vm1077_vm15, %v2208_v0, %v904_v25  ;;  %v1615_v25 = vld [vmem:[%s2416_s16] ss:$0 sm:$0xff] }
 0xda4   :  { %v547_v41 = vpop.permute.xlu1 %546 }
 0xda5   :  { %vm550_vm3 = vcmp.eq.s32.totalorder %v547_v41, 1 }
 0xdb8   :  { %v1230_v52 = vpop.permute.xlu2 %1229 }
 0xdb9   :  { %v1236_v38 = vmul.f32 %v1230_v52, %v2234_v13  ;;  %v1295_v13 = vld [vmem:[%s2412_s12] sm:$0xff] }
 0xdf0   :  { %v1226_v42 = vpop.permute.xlu0 %1225 }
 0xdf1   :  { %v1234_v43 = vmul.f32 %v1226_v42, %v2239_v19  ;;  %v1471_v42 = vld [vmem:[%s2415_s15 + $0x10] sm:$0xff] }
 0xdf3   :  { %v1255_v17 = vsel %vm1252_vm12, %v1234_v43, %v1079_v28  ;;  %v1470_v43 = vld [vmem:[%s2415_s15 + $0x8] sm:$0xff] }
 0xdf4   :  { %1302 = vrot.lane.b32.xlu1 %v1255_v17, %s1789_s27 }
 0xdf8   :  { %v1228_v47 = vpop.permute.xlu1 %1227  ;;  %v371_v49 = vpop.permute.xlu0 %370 }
 0xdf9   :  { %v1235_v19 = vmul.f32 %v1228_v47, %v2248_v35  ;;  %vm374_vm2 = vcmp.eq.s32.totalorder %v371_v49, 1 }
 0xdfa   :  { %v377_v27 = vsel %vm374_vm2, %v1959_v24, 0.0 }
 0xdfb   :  { %v1256_v7 = vsel %vm1253_vm1, %v1235_v19, %v1080_v6  ;;  %v553_v51 = vsel %vm550_vm3, %v2032_v21, %v377_v27  ;;  %v1289_v21 = vpop.f32.mrf.mxu1 }
 0xdfc   :  { %1304 = vrot.lane.b32.xlu2 %v1256_v7, %s1789_s27  ;;  %1463 = vperm.xlu1 %1611, %v1460_v26   ;;  %v729_v54 = vsel %vm726_vm6, %v2099_v57, %v553_v51  ;;  %v1298_v57 = vld [vmem:[%s2412_s12 + $0x18] sm:$0xff] }
 0xdfd   :  { %1363 = vmatpush.msrb.mxu3 %v1289_v21  ;;  %1326 = vmatpush.msrb.mxu2 %v1298_v57 }
 0xdff   :  { %1364 = vmatpush.msrb.mxu3 %v1286_v58 }
 0xe00   :  { %v899_v50 = vpop.permute.xlu0 %898  ;;  %v1075_v35 = vpop.permute.xlu1 %1074  ;;  %1595 = vmatmul.msk.f32.vlgmr.msrb.gmra.mxu3 %vm1262_vm4, %v1292_v59 }
 0xe01   :  { %vm902_vm5 = vcmp.eq.s32.totalorder %v899_v50, 1  ;;  %vm1078_vm0 = vcmp.eq.s32.totalorder %v1075_v35, 1 }
 0xe02   :  { %v905_v0 = vsel %vm902_vm5, %v2150_v36, %v729_v54  ;;  %v1297_v36 = vld [vmem:[%s2412_s12 + $0x10] sm:$0xff] }
 0xe03   :  { %v1081_v56 = vsel %vm1078_vm0, %v2200_v16, %v905_v0  ;;  %v1296_v16 = vld [vmem:[%s2412_s12 + $0x8] sm:$0xff]  ;;  %1327 = vmatpush.msrb.mxu2 %v1297_v36 }
 0xe05   :  { %1328 = vmatpush.msrb.mxu2 %v1296_v16 }
 0xe07   :  { %1329 = vmatpush.msrb.mxu2 %v1295_v13 }
 0xe08   :  { %v1251_v11 = vpop.permute.xlu0 %1250  ;;  %1596 = vmatmul.msk.f32.gmra.mxu3 %vm1262_vm4, %v1293_v60 }
 0xe09   :  { %vm1254_vm7 = vcmp.eq.s32.totalorder %v1251_v11, 1  ;;  %1453 = vmatpush.msra.mxu2 %v1435_v1 }
 0xe0a   :  { %v1257_v24 = vsel %vm1254_vm7, %v1236_v38, %v1081_v56 }
 0xe0b   :  { %1306 = vrot.lane.b32.xlu0 %v1257_v24, %s1789_s27  ;;  %1454 = vmatpush.msra.mxu2 %v1434_v34 }
 0xe10   :  { %1597 = vmatmul.msk.f32.gmra.mxu3 %vm1262_vm4, %v1294_v61 }
 0xe56   :  { %v1305_v63 = vpop.permute.xlu2 %1304 }
 0xe66   :  { %v1303_v62 = vpop.permute.xlu1 %1302 }
 0xe67   :  { %1592 = vmatmul.msk.f32.vlgmr.msrb.gmra.mxu2 %vm213_vm13, %v1303_v62 }
 0xe6e   :  { %v1464_v17 = vpop.permute.xlu1 %1463 }
 0xe6f   :  { %1593 = vmatmul.msk.f32.gmra.mxu2 %vm213_vm13, %v1305_v63 }
 0xe7d   :  { %v1307_v3 = vpop.permute.xlu0 %1306 }
 0xe7e   :  { %1594 = vmatmul.msk.f32.gmra.mxu2 %vm213_vm13, %v1307_v3 }
 0xe83   :  { %v1366_v32 = vpop.f32.mrf.mxu3 }
 0xe8b   :  { %v1369_v39 = vpop.f32.mrf.mxu3 }
 0xe93   :  { %v1372_v8 = vpop.f32.mrf.mxu3 }
 0xeea   :  { %v1331_v55 = vpop.f32.mrf.mxu2 }
 0xeeb   :  { %v1367_v18 = vadd.f32 %v1366_v32, %v1331_v55 }
 0xeed   :  { %v1379_v23 = vadd.f32 %v1614_v9, %v1367_v18 }
 0xeef   :  { %v1382_v30 = vmax.f32 %v1379_v23, 0.0 }
 0xef2   :  { %v1334_v4 = vpop.f32.mrf.mxu2 }
 0xef3   :  { %v1370_v5 = vadd.f32 %v1369_v39, %v1334_v4 }
 0xef5   :  { %v1380_v22 = vadd.f32 %v1614_v9, %v1370_v5 }
 0xef7   :  { %v1383_v29 = vmax.f32 %v1380_v22, 0.0 }
 0xf01   :  { %v1337_v10 = vpop.f32.mrf.mxu2 }
 0xf02   :  { %v1373_v20 = vadd.f32 %v1372_v8, %v1337_v10 }
 0xf04   :  { %v1381_v40 = vadd.f32 %v1614_v9, %v1373_v20 }
 0xf06   :  { %v1384_v53 = vmax.f32 %v1381_v40, 0.0 }
 0xf08   :  { %1403 = vmatpush.msrb.mxu1 %v1384_v53 }
 0xf0a   :  { %1404 = vmatpush.msrb.mxu1 %v1383_v29 }
 0xf0c   :  { %1405 = vmatpush.msrb.mxu1 %v1382_v30 }
 0xf0d   :  { %1598 = vmatmul.msk.f32.vlgmr.msrb.gmra.mxu1 %vm1386_vm8, %v1385_v31 }
 0xf0e   :  { %1428 = vmatpush.msra.mxu1 %v2299_v14  ;;  %v1467_v14 = vld [vmem:[%s2414_s14] sm:$0xff] }
 0xf10   :  { %1429 = vmatpush.msra.mxu1 %v2292_v15  ;;  %v1472_v15 = vld [vmem:[%s2415_s15 + $0x18] sm:$0xff]  ;;  %s1530_s15 = sshll.u32 %s2417_s17, 4  ;;  %s1531_s15 = int_to_ptr.hbm [resolvable:$true] %s1530_s15 }
 0xf11   :  { %1488 = vmatpush.msra.mxu3 %v1472_v15 }
 0xf12   :  { %1510 = vmatpush.msrb.mxu1 %v1468_v33 }
 0xf13   :  { %1489 = vmatpush.msra.mxu3 %v1471_v42 }
 0xf14   :  { %1511 = vmatpush.msrb.mxu1 %v1467_v14 }
 0xf15   :  { %1599 = vmatmul.msk.f32.vlgmr.msra.gmra.mxu1 %vm1262_vm4, %v1410_v12  ;;  %1490 = vmatpush.msra.mxu3 %v1470_v43 }
 0xf17   :  { %1491 = vmatpush.msra.mxu3 %v1469_v44 }
 0xf8a   :  { %v1407_v37 = vpop.f32.mrf.mxu1 }
 0xf92   :  { %v1431_v41 = vpop.f32.mrf.mxu1 }
 0xf93   :  { %1600 = vmatmul.msk.f32.vlgmr.msra.gmra.mxu2 %vm1262_vm4, %v1431_v41  ;;  %1602 = vmatmul.msk.f32.vlgmr.msrb.gmra.mxu1 %vm1262_vm4, %v1431_v41 }
0x1010   :  { %v1513_v47 = vpop.f32.mrf.mxu1 }
0x1016   :  { %v1456_v28 = vpop.f32.mrf.mxu2 }
0x1017   :  { %v1457_v2 = vadd.f32 %v1614_v9, %v1456_v28 }
0x1019   :  { %v1459_v45 = vsub.f32 %v1407_v37, %v1457_v2 }
0x101b   :  { %v1466_v46 = vmul.f32 %v1464_v17, %v1459_v45 }
0x101d   :  { %1601 = vmatmul.msk.f32.vlgmr.msra.gmra.mxu3 %vm213_vm13, %v1466_v46 }
0x10a0   :  { %v1493_v49 = vpop.f32.mrf.mxu3 }
0x10a1   :  { %v1514_v19 = vadd.f32 %v1513_v47, %v1493_v49 }
0x10a3   :  { %v1520_v26 = vadd.f32 %v1615_v25, %v1514_v19 }
0x10a5   :  { %v1521_v6 = vmax.f32 %v1520_v26, 0.0 }
0x10a7   :  { %1522 = vst.msk [vmem:[#allocation2] sm:$0xff] %vm213_vm13, %v1521_v6 }
0x10a8   :  { %1533 = dma.vmem_to_hbm [thread:$0]  %s1529_s21, 128, %s1531_s15, [#allocation3]  }
0x10a9   :  { %1785 = dma.done.wait [#allocation3], 128  }
0x10aa   :  { %1786 = vsyncadd [#allocation3], 4294967168 }
0x10ab   :  { %1538 = vsyncpa [#allocation3], 1 }

</bundles_post_ra>
